<compile_context>
chip_gen: v6e
topology: v6e:2x2x1
jax: 0.10.0
libtpu: 0.0.40
codegen_flags: <defaults>
</compile_context>

<pallas_src>
import functools

import numpy as np

import jax
import jax.numpy as jnp
from jax import lax
from jax.experimental import pallas as pl
from jax.experimental.pallas import tpu as pltpu


_VMEM = pl.BlockSpec(memory_space=pltpu.MemorySpace.VMEM)


# ----------------------- trace-time constant builders ----------------------- #

def _bilinear_weights(out_size, in_size):
    """(out,in) row-stochastic matrix == F.interpolate(bilinear, align_corners=False)."""
    if out_size == in_size:
        return np.eye(out_size, dtype=np.float32)
    scale = in_size / out_size
    dst = np.arange(out_size, dtype=np.float64)
    src = np.maximum((dst + 0.5) * scale - 0.5, 0.0)
    i0 = np.clip(np.floor(src).astype(np.int64), 0, in_size - 1)
    i1 = np.minimum(i0 + 1, in_size - 1)
    frac = src - i0
    w = np.zeros((out_size, in_size), np.float64)
    rows = np.arange(out_size)
    w[rows, i0] += 1.0 - frac
    w[rows, i1] += frac
    return w.astype(np.float32)


def _upsample_matrix(n, ph, pw, h, w):
    """(n*ph*pw, n*H*W): separable bilinear upsample with per-batch block structure."""
    wh = _bilinear_weights(h, ph)                       # (H, ph)
    ww = _bilinear_weights(w, pw)                       # (W, pw)
    us = np.einsum('yt,xu->tuyx', wh, ww).reshape(ph * pw, h * w).astype(np.float32)
    u = np.zeros((n * ph * pw, n * h * w), np.float32)
    for b in range(n):
        u[b * ph * pw:(b + 1) * ph * pw, b * h * w:(b + 1) * h * w] = us
    return u


def _conv3x3_gather_matrices(n, ph, pw):
    """9 x (n*ph*pw, n*ph*pw) 0/1 tap-gather matrices for a 3x3 / pad=1 conv on a
    (ph, pw) map: a[t, p, q] = 1 iff q is the (in-bounds) tap-t neighbour of p."""
    sz = ph * pw
    a = np.zeros((9, n * sz, n * sz), np.float32)
    for dy in range(3):
        for dx in range(3):
            t = dy * 3 + dx
            for i in range(ph):
                for j in range(pw):
                    ii, jj = i + dy - 1, j + dx - 1
                    if 0 <= ii < ph and 0 <= jj < pw:
                        for b in range(n):
                            a[t, b * sz + i * pw + j, b * sz + ii * pw + jj] = 1.0
    return a


# ------------------------------- fused kernel ------------------------------- #

def _esa_kernel(x_ref, pat_ref, w2_ref, b2_ref, wm_ref, bm_ref, w3_ref, b3_ref,
                w3p_ref, b3p_ref, at_ref, u_ref, wx_ref, w4_ref, bc_ref, o_ref,
                *, n, ho, wo, ph, pw, pk, ps, f):
    f32 = jnp.float32
    x = x_ref[...]                                                   # (C, M) lane-dense

    # conv2 o conv1 (3x3 stride-2 VALID composed with the 1x1), lane-dense:
    # (f, 9C) @ (9C, n*ho*wo) -> (f, n*ho*wo), column = b*ho*wo + oh*wo + ow
    c1 = jnp.dot(w2_ref[...], pat_ref[...], preferred_element_type=f32) + b2_ref[...]

    # max_pool2d(kernel=pk, stride=ps): value-based, lane-dense; no scratch ref,
    # no masked per-row stores.  Output column = b*ph*pw + oi*pw + oj.
    cols = []
    for b in range(n):
        base = b * ho * wo
        rows = [c1[:, base + r * wo: base + (r + 1) * wo]            # (f, wo) row slices
                for r in range(ps * (ph - 1) + pk)]
        for oi in range(ph):
            hred = rows[ps * oi]
            for r in range(1, pk):                                   # reduce window rows
                hred = jnp.maximum(hred, rows[ps * oi + r])
            for oj in range(pw):                                     # reduce window cols
                cols.append(jnp.max(hred[:, ps * oj: ps * oj + pk],
                                    axis=1, keepdims=True))          # (f, 1)
    v_max = jnp.concatenate(cols, axis=1)                            # (f, n*ph*pw)

    # 3x3 / pad=1 convs on the tiny pooled map, lane-dense:
    #   stage 1: all 9 per-tap channel mixes in ONE dot  (9f, f) @ (f, npp)
    #   stage 2: spatial gather + tap sum: 9 tiny dots on sublane slices of P
    def small_conv3x3(v, wbig_ref, b_col_ref):
        p_all = jnp.dot(wbig_ref[...], v, preferred_element_type=f32)       # (9f, npp)
        acc = jnp.dot(p_all[0:f, :], at_ref[0], preferred_element_type=f32)
        for t in range(1, 9):
            acc = acc + jnp.dot(p_all[t * f:(t + 1) * f, :], at_ref[t],
                                preferred_element_type=f32)
        return acc + b_col_ref[...]                                          # (f, npp)

    v_range = jnp.maximum(small_conv3x3(v_max, wm_ref, bm_ref), 0.0)   # relu(conv_max)
    c3 = jnp.maximum(small_conv3x3(v_range, w3_ref, b3_ref), 0.0)      # relu(conv3)
    c3 = small_conv3x3(c3, w3p_ref, b3p_ref)                           # conv3_

    # conv4 folded into the tiny pooled branch: (C, f) @ (f, npp) -> (C, npp)
    t1 = jnp.dot(w4_ref[...], c3, preferred_element_type=f32)

    # M-wide epilogue: only TWO 2048-lane matmuls (conv1/conv_f/conv4 composed):
    #   m = (W4·Wf·W1) @ x  +  (W4 @ c3) @ U  +  const
    m_lin = (jnp.dot(wx_ref[...], x, preferred_element_type=f32)
             + jnp.dot(t1, u_ref[...], preferred_element_type=f32)
             + bc_ref[...])
    m = 0.5 * (1.0 + jnp.tanh(0.5 * m_lin))                            # sigmoid on EUP
    o_ref[...] = (x * m).astype(o_ref.dtype)


# --------------------------------- wrapper ---------------------------------- #

def esa_forward(x, p):
    n, h, w, c = x.shape
    f = p["w1"].shape[1]
    m = n * h * w
    ho = (h - 3) // 2 + 1
    wo = (w - 3) // 2 + 1
    pk, ps = 7, 3
    ph = (ho - pk) // ps + 1
    pw = (wo - pk) // ps + 1

    # ---- layout plumbing + weight composition (tiny XLA ops / numpy constants) ----
    # TODO(synk): fold the big C<->M transposes into the kernel (one ~32-vreg
    #             transpose each) if xprof shows XLA does not fuse them.
    x_cm = x.reshape(m, c).T                                           # (C, M)

    # stride-2 3x3 taps of x gathered on the 15x15 conv2 output grid, lane-dense
    taps = [x[:, dy:dy + 2 * (ho - 1) + 1:2, dx:dx + 2 * (wo - 1) + 1:2, :]
            for dy in range(3) for dx in range(3)]                     # 9 x (n, ho, wo, C)
    patches_t = jnp.concatenate(taps, axis=-1).reshape(n * ho * wo, 9 * c).T   # (9C, n*ho*wo)

    # compose conv2 (3x3,s2) with the preceding 1x1 conv1 (lane-dense weights)
    w2c_t = jnp.einsum('kc,yxco->oyxk', p["w1"], p["w2"]).reshape(f, 9 * c)
    b2c = (jnp.einsum('yxco,c->o', p["w2"], p["b1"][0]) + p["b2"][0]).reshape(f, 1)

    # stacked per-tap channel-mix weights: Wbig[t*f + cout, cin] = w[dy,dx,cin,cout]
    def wbig(wt):
        return jnp.transpose(wt.reshape(9, f, f), (0, 2, 1)).reshape(9 * f, f)

    # compose conv4 o conv_f o conv1 along the x path (1x1 chain) + constant bias
    w1m, wfm, w4m = p["w1"].T, p["wf"].T, p["w4"].T                    # (f,C),(f,f),(C,f)
    wx = w4m @ (wfm @ w1m)                                             # (C, C)
    b_const = (w4m @ (wfm @ p["b1"][0] + p["bf"][0]) + p["b4"][0]).reshape(c, 1)

    at_mats = jnp.asarray(
        _conv3x3_gather_matrices(n, ph, pw).transpose(0, 2, 1))        # (9, npp, npp) = A_t^T
    u_mat = jnp.asarray(_upsample_matrix(n, ph, pw, h, w))             # (npp, M)

    operands = (
        x_cm, patches_t,
        w2c_t, b2c,
        wbig(p["w_max"]), p["b_max"].reshape(f, 1),
        wbig(p["w3"]), p["b3"].reshape(f, 1),
        wbig(p["w3_"]), p["b3_"].reshape(f, 1),
        at_mats, u_mat,
        wx, w4m, b_const,
    )

    kernel = functools.partial(_esa_kernel, n=n, ho=ho, wo=wo, ph=ph, pw=pw,
                               pk=pk, ps=ps, f=f)
    out_cm = pl.pallas_call(
        kernel,
        out_shape=jax.ShapeDtypeStruct((c, m), jnp.float32),
        in_specs=[_VMEM] * len(operands),
        out_specs=_VMEM,
    )(*operands)

    return out_cm.T.reshape(n, h, w, c)


# --------------------------- pure-JAX reference ------------------------------ #

def esa_reference(x, p):
    dn = ("NHWC", "HWIO", "NHWC")

    def conv(xx, wt, b, stride=1, pad="SAME"):
        if wt.ndim == 2:
            wt = wt[None, None]
        y = lax.conv_general_dilated(xx, wt, (stride, stride), pad, dimension_numbers=dn)
        return y + b.reshape(1, 1, 1, -1)

    n, h, w_sp, _ = x.shape
    c1_ = conv(x, p["w1"], p["b1"])
    c1 = conv(c1_, p["w2"], p["b2"], stride=2, pad="VALID")
    v_max = lax.reduce_window(c1, -jnp.inf, lax.max, (1, 7, 7, 1), (1, 3, 3, 1), "VALID")
    v_range = jax.nn.relu(conv(v_max, p["w_max"], p["b_max"]))
    c3 = jax.nn.relu(conv(v_range, p["w3"], p["b3"]))
    c3 = conv(c3, p["w3_"], p["b3_"])
    c3 = jax.image.resize(c3, (n, h, w_sp, c3.shape[-1]), method="bilinear")
    cf = conv(c1_, p["wf"], p["bf"])
    c4 = conv(c3 + cf, p["w4"], p["b4"])
    return x * jax.nn.sigmoid(c4)


# ------------------------------- parameters ---------------------------------- #

def init_params(key, n_feats):
    f = n_feats // 4
    ks = jax.random.split(key, 14)

    def rnd(k, shape, fan_in):
        return jax.random.normal(k, shape, jnp.float32) / jnp.sqrt(float(fan_in))

    return {
        "w1": rnd(ks[0], (n_feats, f), n_feats),   "b1": rnd(ks[1], (1, f), n_feats),
        "wf": rnd(ks[2], (f, f), f),               "bf": rnd(ks[3], (1, f), f),
        "w_max": rnd(ks[4], (3, 3, f, f), 9 * f),  "b_max": rnd(ks[5], (1, f), 9 * f),
        "w2": rnd(ks[6], (3, 3, f, f), 9 * f),     "b2": rnd(ks[7], (1, f), 9 * f),
        "w3": rnd(ks[8], (3, 3, f, f), 9 * f),     "b3": rnd(ks[9], (1, f), 9 * f),
        "w3_": rnd(ks[10], (3, 3, f, f), 9 * f),   "b3_": rnd(ks[11], (1, f), 9 * f),
        "w4": rnd(ks[12], (f, n_feats), f),        "b4": rnd(ks[13], (1, n_feats), f),
    }


# ---------------------------------- main -------------------------------------- #

if __name__ == "__main__":
    key = jax.random.PRNGKey(0)
    kx, kp = jax.random.split(key)

    n_feats = 16          # f = n_feats // 4 = 4
    N, H, W = 2, 32, 32   # NHWC input (equivalent to PyTorch NCHW (2, 16, 32, 32))

    x = jax.random.normal(kx, (N, H, W, n_feats), jnp.float32)
    params = init_params(kp, n_feats)

    out = jax.jit(esa_forward)(x, params)
    out = jax.block_until_ready(out)

    ref = esa_reference(x, params)
    np.testing.assert_allclose(np.asarray(out), np.asarray(ref), rtol=2e-4, atol=2e-4)

    print("KERNEL_OK")
</pallas_src>

<mosaic_0001>
module attributes {stable_mosaic.version = 11 : i64} {
  func.func @_esa_kernel(%arg0: memref<16x2048xf32, #tpu.memory_space<vmem>>, %arg1: memref<144x450xf32, #tpu.memory_space<vmem>>, %arg2: memref<4x144xf32, #tpu.memory_space<vmem>>, %arg3: memref<4x1xf32, #tpu.memory_space<vmem>>, %arg4: memref<36x4xf32, #tpu.memory_space<vmem>>, %arg5: memref<4x1xf32, #tpu.memory_space<vmem>>, %arg6: memref<36x4xf32, #tpu.memory_space<vmem>>, %arg7: memref<4x1xf32, #tpu.memory_space<vmem>>, %arg8: memref<36x4xf32, #tpu.memory_space<vmem>>, %arg9: memref<4x1xf32, #tpu.memory_space<vmem>>, %arg10: memref<9x18x18xf32, #tpu.memory_space<vmem>>, %arg11: memref<18x2048xf32, #tpu.memory_space<vmem>>, %arg12: memref<16x16xf32, #tpu.memory_space<vmem>>, %arg13: memref<16x4xf32, #tpu.memory_space<vmem>>, %arg14: memref<16x1xf32, #tpu.memory_space<vmem>>, %arg15: memref<16x2048xf32, #tpu.memory_space<vmem>>) attributes {dimension_semantics = [], scalar_prefetch = 0 : i64, scratch_operands = 0 : i64, tpu.core_type = #tpu.core_type<tc>} {
    %c0 = arith.constant 0 : index
    %c0_0 = arith.constant 0 : index
    %0 = vector.load %arg0[%c0, %c0_0] : memref<16x2048xf32, #tpu.memory_space<vmem>>, vector<16x2048xf32>
    %c0_1 = arith.constant 0 : index
    %c0_2 = arith.constant 0 : index
    %1 = vector.load %arg2[%c0_1, %c0_2] : memref<4x144xf32, #tpu.memory_space<vmem>>, vector<4x144xf32>
    %c0_3 = arith.constant 0 : index
    %c0_4 = arith.constant 0 : index
    %2 = vector.load %arg1[%c0_3, %c0_4] : memref<144x450xf32, #tpu.memory_space<vmem>>, vector<144x450xf32>
    %cst = arith.constant dense<0.000000e+00> : vector<4x450xf32>
    %3 = tpu.matmul %1, %2, %cst {dimension_numbers = #tpu.dot_dimension_numbers<[1], [0], [0], [1], [0, 0, 1, 1], [], []>} : vector<4x144xf32>, vector<144x450xf32>, vector<4x450xf32> -> vector<4x450xf32>
    %c0_5 = arith.constant 0 : index
    %c0_6 = arith.constant 0 : index
    %4 = vector.load %arg3[%c0_5, %c0_6] : memref<4x1xf32, #tpu.memory_space<vmem>>, vector<4x1xf32>
    %5 = vector.broadcast %4 : vector<4x1xf32> to vector<4x450xf32>
    %6 = arith.addf %3, %5 : vector<4x450xf32>
    %7 = vector.extract_strided_slice %6 {offsets = [0, 0], sizes = [4, 15], strides = [1, 1]} : vector<4x450xf32> to vector<4x15xf32>
    %8 = vector.extract_strided_slice %6 {offsets = [0, 15], sizes = [4, 15], strides = [1, 1]} : vector<4x450xf32> to vector<4x15xf32>
    %9 = vector.extract_strided_slice %6 {offsets = [0, 30], sizes = [4, 15], strides = [1, 1]} : vector<4x450xf32> to vector<4x15xf32>
    %10 = vector.extract_strided_slice %6 {offsets = [0, 45], sizes = [4, 15], strides = [1, 1]} : vector<4x450xf32> to vector<4x15xf32>
    %11 = vector.extract_strided_slice %6 {offsets = [0, 60], sizes = [4, 15], strides = [1, 1]} : vector<4x450xf32> to vector<4x15xf32>
    %12 = vector.extract_strided_slice %6 {offsets = [0, 75], sizes = [4, 15], strides = [1, 1]} : vector<4x450xf32> to vector<4x15xf32>
    %13 = vector.extract_strided_slice %6 {offsets = [0, 90], sizes = [4, 15], strides = [1, 1]} : vector<4x450xf32> to vector<4x15xf32>
    %14 = vector.extract_strided_slice %6 {offsets = [0, 105], sizes = [4, 15], strides = [1, 1]} : vector<4x450xf32> to vector<4x15xf32>
    %15 = vector.extract_strided_slice %6 {offsets = [0, 120], sizes = [4, 15], strides = [1, 1]} : vector<4x450xf32> to vector<4x15xf32>
    %16 = vector.extract_strided_slice %6 {offsets = [0, 135], sizes = [4, 15], strides = [1, 1]} : vector<4x450xf32> to vector<4x15xf32>
    %17 = vector.extract_strided_slice %6 {offsets = [0, 150], sizes = [4, 15], strides = [1, 1]} : vector<4x450xf32> to vector<4x15xf32>
    %18 = vector.extract_strided_slice %6 {offsets = [0, 165], sizes = [4, 15], strides = [1, 1]} : vector<4x450xf32> to vector<4x15xf32>
    %19 = vector.extract_strided_slice %6 {offsets = [0, 180], sizes = [4, 15], strides = [1, 1]} : vector<4x450xf32> to vector<4x15xf32>
    %20 = arith.maximumf %7, %8 : vector<4x15xf32>
    %21 = arith.maximumf %20, %9 : vector<4x15xf32>
    %22 = arith.maximumf %21, %10 : vector<4x15xf32>
    %23 = arith.maximumf %22, %11 : vector<4x15xf32>
    %24 = arith.maximumf %23, %12 : vector<4x15xf32>
    %25 = arith.maximumf %24, %13 : vector<4x15xf32>
    %26 = vector.extract_strided_slice %25 {offsets = [0, 0], sizes = [4, 7], strides = [1, 1]} : vector<4x15xf32> to vector<4x7xf32>
    %cst_7 = arith.constant dense<0xFF800000> : vector<4xf32>
    %27 = vector.multi_reduction <maximumf>, %26, %cst_7 [1] : vector<4x7xf32> to vector<4xf32>
    %28 = vector.shape_cast %27 : vector<4xf32> to vector<4x1xf32>
    %29 = vector.extract_strided_slice %25 {offsets = [0, 3], sizes = [4, 7], strides = [1, 1]} : vector<4x15xf32> to vector<4x7xf32>
    %cst_8 = arith.constant dense<0xFF800000> : vector<4xf32>
    %30 = vector.multi_reduction <maximumf>, %29, %cst_8 [1] : vector<4x7xf32> to vector<4xf32>
    %31 = vector.shape_cast %30 : vector<4xf32> to vector<4x1xf32>
    %32 = vector.extract_strided_slice %25 {offsets = [0, 6], sizes = [4, 7], strides = [1, 1]} : vector<4x15xf32> to vector<4x7xf32>
    %cst_9 = arith.constant dense<0xFF800000> : vector<4xf32>
    %33 = vector.multi_reduction <maximumf>, %32, %cst_9 [1] : vector<4x7xf32> to vector<4xf32>
    %34 = vector.shape_cast %33 : vector<4xf32> to vector<4x1xf32>
    %35 = arith.maximumf %10, %11 : vector<4x15xf32>
    %36 = arith.maximumf %35, %12 : vector<4x15xf32>
    %37 = arith.maximumf %36, %13 : vector<4x15xf32>
    %38 = arith.maximumf %37, %14 : vector<4x15xf32>
    %39 = arith.maximumf %38, %15 : vector<4x15xf32>
    %40 = arith.maximumf %39, %16 : vector<4x15xf32>
    %41 = vector.extract_strided_slice %40 {offsets = [0, 0], sizes = [4, 7], strides = [1, 1]} : vector<4x15xf32> to vector<4x7xf32>
    %cst_10 = arith.constant dense<0xFF800000> : vector<4xf32>
    %42 = vector.multi_reduction <maximumf>, %41, %cst_10 [1] : vector<4x7xf32> to vector<4xf32>
    %43 = vector.shape_cast %42 : vector<4xf32> to vector<4x1xf32>
    %44 = vector.extract_strided_slice %40 {offsets = [0, 3], sizes = [4, 7], strides = [1, 1]} : vector<4x15xf32> to vector<4x7xf32>
    %cst_11 = arith.constant dense<0xFF800000> : vector<4xf32>
    %45 = vector.multi_reduction <maximumf>, %44, %cst_11 [1] : vector<4x7xf32> to vector<4xf32>
    %46 = vector.shape_cast %45 : vector<4xf32> to vector<4x1xf32>
    %47 = vector.extract_strided_slice %40 {offsets = [0, 6], sizes = [4, 7], strides = [1, 1]} : vector<4x15xf32> to vector<4x7xf32>
    %cst_12 = arith.constant dense<0xFF800000> : vector<4xf32>
    %48 = vector.multi_reduction <maximumf>, %47, %cst_12 [1] : vector<4x7xf32> to vector<4xf32>
    %49 = vector.shape_cast %48 : vector<4xf32> to vector<4x1xf32>
    %50 = arith.maximumf %13, %14 : vector<4x15xf32>
    %51 = arith.maximumf %50, %15 : vector<4x15xf32>
    %52 = arith.maximumf %51, %16 : vector<4x15xf32>
    %53 = arith.maximumf %52, %17 : vector<4x15xf32>
    %54 = arith.maximumf %53, %18 : vector<4x15xf32>
    %55 = arith.maximumf %54, %19 : vector<4x15xf32>
    %56 = vector.extract_strided_slice %55 {offsets = [0, 0], sizes = [4, 7], strides = [1, 1]} : vector<4x15xf32> to vector<4x7xf32>
    %cst_13 = arith.constant dense<0xFF800000> : vector<4xf32>
    %57 = vector.multi_reduction <maximumf>, %56, %cst_13 [1] : vector<4x7xf32> to vector<4xf32>
    %58 = vector.shape_cast %57 : vector<4xf32> to vector<4x1xf32>
    %59 = vector.extract_strided_slice %55 {offsets = [0, 3], sizes = [4, 7], strides = [1, 1]} : vector<4x15xf32> to vector<4x7xf32>
    %cst_14 = arith.constant dense<0xFF800000> : vector<4xf32>
    %60 = vector.multi_reduction <maximumf>, %59, %cst_14 [1] : vector<4x7xf32> to vector<4xf32>
    %61 = vector.shape_cast %60 : vector<4xf32> to vector<4x1xf32>
    %62 = vector.extract_strided_slice %55 {offsets = [0, 6], sizes = [4, 7], strides = [1, 1]} : vector<4x15xf32> to vector<4x7xf32>
    %cst_15 = arith.constant dense<0xFF800000> : vector<4xf32>
    %63 = vector.multi_reduction <maximumf>, %62, %cst_15 [1] : vector<4x7xf32> to vector<4xf32>
    %64 = vector.shape_cast %63 : vector<4xf32> to vector<4x1xf32>
    %65 = vector.extract_strided_slice %6 {offsets = [0, 225], sizes = [4, 15], strides = [1, 1]} : vector<4x450xf32> to vector<4x15xf32>
    %66 = vector.extract_strided_slice %6 {offsets = [0, 240], sizes = [4, 15], strides = [1, 1]} : vector<4x450xf32> to vector<4x15xf32>
    %67 = vector.extract_strided_slice %6 {offsets = [0, 255], sizes = [4, 15], strides = [1, 1]} : vector<4x450xf32> to vector<4x15xf32>
    %68 = vector.extract_strided_slice %6 {offsets = [0, 270], sizes = [4, 15], strides = [1, 1]} : vector<4x450xf32> to vector<4x15xf32>
    %69 = vector.extract_strided_slice %6 {offsets = [0, 285], sizes = [4, 15], strides = [1, 1]} : vector<4x450xf32> to vector<4x15xf32>
    %70 = vector.extract_strided_slice %6 {offsets = [0, 300], sizes = [4, 15], strides = [1, 1]} : vector<4x450xf32> to vector<4x15xf32>
    %71 = vector.extract_strided_slice %6 {offsets = [0, 315], sizes = [4, 15], strides = [1, 1]} : vector<4x450xf32> to vector<4x15xf32>
    %72 = vector.extract_strided_slice %6 {offsets = [0, 330], sizes = [4, 15], strides = [1, 1]} : vector<4x450xf32> to vector<4x15xf32>
    %73 = vector.extract_strided_slice %6 {offsets = [0, 345], sizes = [4, 15], strides = [1, 1]} : vector<4x450xf32> to vector<4x15xf32>
    %74 = vector.extract_strided_slice %6 {offsets = [0, 360], sizes = [4, 15], strides = [1, 1]} : vector<4x450xf32> to vector<4x15xf32>
    %75 = vector.extract_strided_slice %6 {offsets = [0, 375], sizes = [4, 15], strides = [1, 1]} : vector<4x450xf32> to vector<4x15xf32>
    %76 = vector.extract_strided_slice %6 {offsets = [0, 390], sizes = [4, 15], strides = [1, 1]} : vector<4x450xf32> to vector<4x15xf32>
    %77 = vector.extract_strided_slice %6 {offsets = [0, 405], sizes = [4, 15], strides = [1, 1]} : vector<4x450xf32> to vector<4x15xf32>
    %78 = arith.maximumf %65, %66 : vector<4x15xf32>
    %79 = arith.maximumf %78, %67 : vector<4x15xf32>
    %80 = arith.maximumf %79, %68 : vector<4x15xf32>
    %81 = arith.maximumf %80, %69 : vector<4x15xf32>
    %82 = arith.maximumf %81, %70 : vector<4x15xf32>
    %83 = arith.maximumf %82, %71 : vector<4x15xf32>
    %84 = vector.extract_strided_slice %83 {offsets = [0, 0], sizes = [4, 7], strides = [1, 1]} : vector<4x15xf32> to vector<4x7xf32>
    %cst_16 = arith.constant dense<0xFF800000> : vector<4xf32>
    %85 = vector.multi_reduction <maximumf>, %84, %cst_16 [1] : vector<4x7xf32> to vector<4xf32>
    %86 = vector.shape_cast %85 : vector<4xf32> to vector<4x1xf32>
    %87 = vector.extract_strided_slice %83 {offsets = [0, 3], sizes = [4, 7], strides = [1, 1]} : vector<4x15xf32> to vector<4x7xf32>
    %cst_17 = arith.constant dense<0xFF800000> : vector<4xf32>
    %88 = vector.multi_reduction <maximumf>, %87, %cst_17 [1] : vector<4x7xf32> to vector<4xf32>
    %89 = vector.shape_cast %88 : vector<4xf32> to vector<4x1xf32>
    %90 = vector.extract_strided_slice %83 {offsets = [0, 6], sizes = [4, 7], strides = [1, 1]} : vector<4x15xf32> to vector<4x7xf32>
    %cst_18 = arith.constant dense<0xFF800000> : vector<4xf32>
    %91 = vector.multi_reduction <maximumf>, %90, %cst_18 [1] : vector<4x7xf32> to vector<4xf32>
    %92 = vector.shape_cast %91 : vector<4xf32> to vector<4x1xf32>
    %93 = arith.maximumf %68, %69 : vector<4x15xf32>
    %94 = arith.maximumf %93, %70 : vector<4x15xf32>
    %95 = arith.maximumf %94, %71 : vector<4x15xf32>
    %96 = arith.maximumf %95, %72 : vector<4x15xf32>
    %97 = arith.maximumf %96, %73 : vector<4x15xf32>
    %98 = arith.maximumf %97, %74 : vector<4x15xf32>
    %99 = vector.extract_strided_slice %98 {offsets = [0, 0], sizes = [4, 7], strides = [1, 1]} : vector<4x15xf32> to vector<4x7xf32>
    %cst_19 = arith.constant dense<0xFF800000> : vector<4xf32>
    %100 = vector.multi_reduction <maximumf>, %99, %cst_19 [1] : vector<4x7xf32> to vector<4xf32>
    %101 = vector.shape_cast %100 : vector<4xf32> to vector<4x1xf32>
    %102 = vector.extract_strided_slice %98 {offsets = [0, 3], sizes = [4, 7], strides = [1, 1]} : vector<4x15xf32> to vector<4x7xf32>
    %cst_20 = arith.constant dense<0xFF800000> : vector<4xf32>
    %103 = vector.multi_reduction <maximumf>, %102, %cst_20 [1] : vector<4x7xf32> to vector<4xf32>
    %104 = vector.shape_cast %103 : vector<4xf32> to vector<4x1xf32>
    %105 = vector.extract_strided_slice %98 {offsets = [0, 6], sizes = [4, 7], strides = [1, 1]} : vector<4x15xf32> to vector<4x7xf32>
    %cst_21 = arith.constant dense<0xFF800000> : vector<4xf32>
    %106 = vector.multi_reduction <maximumf>, %105, %cst_21 [1] : vector<4x7xf32> to vector<4xf32>
    %107 = vector.shape_cast %106 : vector<4xf32> to vector<4x1xf32>
    %108 = arith.maximumf %71, %72 : vector<4x15xf32>
    %109 = arith.maximumf %108, %73 : vector<4x15xf32>
    %110 = arith.maximumf %109, %74 : vector<4x15xf32>
    %111 = arith.maximumf %110, %75 : vector<4x15xf32>
    %112 = arith.maximumf %111, %76 : vector<4x15xf32>
    %113 = arith.maximumf %112, %77 : vector<4x15xf32>
    %114 = vector.extract_strided_slice %113 {offsets = [0, 0], sizes = [4, 7], strides = [1, 1]} : vector<4x15xf32> to vector<4x7xf32>
    %cst_22 = arith.constant dense<0xFF800000> : vector<4xf32>
    %115 = vector.multi_reduction <maximumf>, %114, %cst_22 [1] : vector<4x7xf32> to vector<4xf32>
    %116 = vector.shape_cast %115 : vector<4xf32> to vector<4x1xf32>
    %117 = vector.extract_strided_slice %113 {offsets = [0, 3], sizes = [4, 7], strides = [1, 1]} : vector<4x15xf32> to vector<4x7xf32>
    %cst_23 = arith.constant dense<0xFF800000> : vector<4xf32>
    %118 = vector.multi_reduction <maximumf>, %117, %cst_23 [1] : vector<4x7xf32> to vector<4xf32>
    %119 = vector.shape_cast %118 : vector<4xf32> to vector<4x1xf32>
    %120 = vector.extract_strided_slice %113 {offsets = [0, 6], sizes = [4, 7], strides = [1, 1]} : vector<4x15xf32> to vector<4x7xf32>
    %cst_24 = arith.constant dense<0xFF800000> : vector<4xf32>
    %121 = vector.multi_reduction <maximumf>, %120, %cst_24 [1] : vector<4x7xf32> to vector<4xf32>
    %122 = vector.shape_cast %121 : vector<4xf32> to vector<4x1xf32>
    %123 = tpu.concatenate %28, %31, %34, %43, %46, %49, %58, %61, %64, %86, %89, %92, %101, %104, %107, %116 in 1 : vector<4x1xf32>, vector<4x1xf32>, vector<4x1xf32>, vector<4x1xf32>, vector<4x1xf32>, vector<4x1xf32>, vector<4x1xf32>, vector<4x1xf32>, vector<4x1xf32>, vector<4x1xf32>, vector<4x1xf32>, vector<4x1xf32>, vector<4x1xf32>, vector<4x1xf32>, vector<4x1xf32>, vector<4x1xf32> -> vector<4x16xf32>
    %124 = tpu.concatenate %119, %122 in 1 : vector<4x1xf32>, vector<4x1xf32> -> vector<4x2xf32>
    %125 = tpu.concatenate %123, %124 in 1 : vector<4x16xf32>, vector<4x2xf32> -> vector<4x18xf32>
    %c0_25 = arith.constant 0 : index
    %c0_26 = arith.constant 0 : index
    %126 = vector.load %arg4[%c0_25, %c0_26] : memref<36x4xf32, #tpu.memory_space<vmem>>, vector<36x4xf32>
    %cst_27 = arith.constant dense<0.000000e+00> : vector<36x18xf32>
    %127 = tpu.matmul %126, %125, %cst_27 {dimension_numbers = #tpu.dot_dimension_numbers<[1], [0], [0], [1], [0, 0, 1, 1], [], []>} : vector<36x4xf32>, vector<4x18xf32>, vector<36x18xf32> -> vector<36x18xf32>
    %128 = vector.extract_strided_slice %127 {offsets = [0, 0], sizes = [4, 18], strides = [1, 1]} : vector<36x18xf32> to vector<4x18xf32>
    %c0_28 = arith.constant 0 : index
    %c0_29 = arith.constant 0 : index
    %c0_30 = arith.constant 0 : index
    %129 = vector.load %arg10[%c0_28, %c0_29, %c0_30] : memref<9x18x18xf32, #tpu.memory_space<vmem>>, vector<1x18x18xf32>
    %130 = vector.shape_cast %129 : vector<1x18x18xf32> to vector<18x18xf32>
    %cst_31 = arith.constant dense<0.000000e+00> : vector<4x18xf32>
    %131 = tpu.matmul %128, %130, %cst_31 {dimension_numbers = #tpu.dot_dimension_numbers<[1], [0], [0], [1], [0, 0, 1, 1], [], []>} : vector<4x18xf32>, vector<18x18xf32>, vector<4x18xf32> -> vector<4x18xf32>
    %132 = vector.extract_strided_slice %127 {offsets = [4, 0], sizes = [4, 18], strides = [1, 1]} : vector<36x18xf32> to vector<4x18xf32>
    %c1 = arith.constant 1 : index
    %c0_32 = arith.constant 0 : index
    %c0_33 = arith.constant 0 : index
    %133 = vector.load %arg10[%c1, %c0_32, %c0_33] : memref<9x18x18xf32, #tpu.memory_space<vmem>>, vector<1x18x18xf32>
    %134 = vector.shape_cast %133 : vector<1x18x18xf32> to vector<18x18xf32>
    %cst_34 = arith.constant dense<0.000000e+00> : vector<4x18xf32>
    %135 = tpu.matmul %132, %134, %cst_34 {dimension_numbers = #tpu.dot_dimension_numbers<[1], [0], [0], [1], [0, 0, 1, 1], [], []>} : vector<4x18xf32>, vector<18x18xf32>, vector<4x18xf32> -> vector<4x18xf32>
    %136 = arith.addf %131, %135 : vector<4x18xf32>
    %137 = vector.extract_strided_slice %127 {offsets = [8, 0], sizes = [4, 18], strides = [1, 1]} : vector<36x18xf32> to vector<4x18xf32>
    %c2 = arith.constant 2 : index
    %c0_35 = arith.constant 0 : index
    %c0_36 = arith.constant 0 : index
    %138 = vector.load %arg10[%c2, %c0_35, %c0_36] : memref<9x18x18xf32, #tpu.memory_space<vmem>>, vector<1x18x18xf32>
    %139 = vector.shape_cast %138 : vector<1x18x18xf32> to vector<18x18xf32>
    %cst_37 = arith.constant dense<0.000000e+00> : vector<4x18xf32>
    %140 = tpu.matmul %137, %139, %cst_37 {dimension_numbers = #tpu.dot_dimension_numbers<[1], [0], [0], [1], [0, 0, 1, 1], [], []>} : vector<4x18xf32>, vector<18x18xf32>, vector<4x18xf32> -> vector<4x18xf32>
    %141 = arith.addf %136, %140 : vector<4x18xf32>
    %142 = vector.extract_strided_slice %127 {offsets = [12, 0], sizes = [4, 18], strides = [1, 1]} : vector<36x18xf32> to vector<4x18xf32>
    %c3 = arith.constant 3 : index
    %c0_38 = arith.constant 0 : index
    %c0_39 = arith.constant 0 : index
    %143 = vector.load %arg10[%c3, %c0_38, %c0_39] : memref<9x18x18xf32, #tpu.memory_space<vmem>>, vector<1x18x18xf32>
    %144 = vector.shape_cast %143 : vector<1x18x18xf32> to vector<18x18xf32>
    %cst_40 = arith.constant dense<0.000000e+00> : vector<4x18xf32>
    %145 = tpu.matmul %142, %144, %cst_40 {dimension_numbers = #tpu.dot_dimension_numbers<[1], [0], [0], [1], [0, 0, 1, 1], [], []>} : vector<4x18xf32>, vector<18x18xf32>, vector<4x18xf32> -> vector<4x18xf32>
    %146 = arith.addf %141, %145 : vector<4x18xf32>
    %147 = vector.extract_strided_slice %127 {offsets = [16, 0], sizes = [4, 18], strides = [1, 1]} : vector<36x18xf32> to vector<4x18xf32>
    %c4 = arith.constant 4 : index
    %c0_41 = arith.constant 0 : index
    %c0_42 = arith.constant 0 : index
    %148 = vector.load %arg10[%c4, %c0_41, %c0_42] : memref<9x18x18xf32, #tpu.memory_space<vmem>>, vector<1x18x18xf32>
    %149 = vector.shape_cast %148 : vector<1x18x18xf32> to vector<18x18xf32>
    %cst_43 = arith.constant dense<0.000000e+00> : vector<4x18xf32>
    %150 = tpu.matmul %147, %149, %cst_43 {dimension_numbers = #tpu.dot_dimension_numbers<[1], [0], [0], [1], [0, 0, 1, 1], [], []>} : vector<4x18xf32>, vector<18x18xf32>, vector<4x18xf32> -> vector<4x18xf32>
    %151 = arith.addf %146, %150 : vector<4x18xf32>
    %152 = vector.extract_strided_slice %127 {offsets = [20, 0], sizes = [4, 18], strides = [1, 1]} : vector<36x18xf32> to vector<4x18xf32>
    %c5 = arith.constant 5 : index
    %c0_44 = arith.constant 0 : index
    %c0_45 = arith.constant 0 : index
    %153 = vector.load %arg10[%c5, %c0_44, %c0_45] : memref<9x18x18xf32, #tpu.memory_space<vmem>>, vector<1x18x18xf32>
    %154 = vector.shape_cast %153 : vector<1x18x18xf32> to vector<18x18xf32>
    %cst_46 = arith.constant dense<0.000000e+00> : vector<4x18xf32>
    %155 = tpu.matmul %152, %154, %cst_46 {dimension_numbers = #tpu.dot_dimension_numbers<[1], [0], [0], [1], [0, 0, 1, 1], [], []>} : vector<4x18xf32>, vector<18x18xf32>, vector<4x18xf32> -> vector<4x18xf32>
    %156 = arith.addf %151, %155 : vector<4x18xf32>
    %157 = vector.extract_strided_slice %127 {offsets = [24, 0], sizes = [4, 18], strides = [1, 1]} : vector<36x18xf32> to vector<4x18xf32>
    %c6 = arith.constant 6 : index
    %c0_47 = arith.constant 0 : index
    %c0_48 = arith.constant 0 : index
    %158 = vector.load %arg10[%c6, %c0_47, %c0_48] : memref<9x18x18xf32, #tpu.memory_space<vmem>>, vector<1x18x18xf32>
    %159 = vector.shape_cast %158 : vector<1x18x18xf32> to vector<18x18xf32>
    %cst_49 = arith.constant dense<0.000000e+00> : vector<4x18xf32>
    %160 = tpu.matmul %157, %159, %cst_49 {dimension_numbers = #tpu.dot_dimension_numbers<[1], [0], [0], [1], [0, 0, 1, 1], [], []>} : vector<4x18xf32>, vector<18x18xf32>, vector<4x18xf32> -> vector<4x18xf32>
    %161 = arith.addf %156, %160 : vector<4x18xf32>
    %162 = vector.extract_strided_slice %127 {offsets = [28, 0], sizes = [4, 18], strides = [1, 1]} : vector<36x18xf32> to vector<4x18xf32>
    %c7 = arith.constant 7 : index
    %c0_50 = arith.constant 0 : index
    %c0_51 = arith.constant 0 : index
    %163 = vector.load %arg10[%c7, %c0_50, %c0_51] : memref<9x18x18xf32, #tpu.memory_space<vmem>>, vector<1x18x18xf32>
    %164 = vector.shape_cast %163 : vector<1x18x18xf32> to vector<18x18xf32>
    %cst_52 = arith.constant dense<0.000000e+00> : vector<4x18xf32>
    %165 = tpu.matmul %162, %164, %cst_52 {dimension_numbers = #tpu.dot_dimension_numbers<[1], [0], [0], [1], [0, 0, 1, 1], [], []>} : vector<4x18xf32>, vector<18x18xf32>, vector<4x18xf32> -> vector<4x18xf32>
    %166 = arith.addf %161, %165 : vector<4x18xf32>
    %167 = vector.extract_strided_slice %127 {offsets = [32, 0], sizes = [4, 18], strides = [1, 1]} : vector<36x18xf32> to vector<4x18xf32>
    %c8 = arith.constant 8 : index
    %c0_53 = arith.constant 0 : index
    %c0_54 = arith.constant 0 : index
    %168 = vector.load %arg10[%c8, %c0_53, %c0_54] : memref<9x18x18xf32, #tpu.memory_space<vmem>>, vector<1x18x18xf32>
    %169 = vector.shape_cast %168 : vector<1x18x18xf32> to vector<18x18xf32>
    %cst_55 = arith.constant dense<0.000000e+00> : vector<4x18xf32>
    %170 = tpu.matmul %167, %169, %cst_55 {dimension_numbers = #tpu.dot_dimension_numbers<[1], [0], [0], [1], [0, 0, 1, 1], [], []>} : vector<4x18xf32>, vector<18x18xf32>, vector<4x18xf32> -> vector<4x18xf32>
    %171 = arith.addf %166, %170 : vector<4x18xf32>
    %c0_56 = arith.constant 0 : index
    %c0_57 = arith.constant 0 : index
    %172 = vector.load %arg5[%c0_56, %c0_57] : memref<4x1xf32, #tpu.memory_space<vmem>>, vector<4x1xf32>
    %173 = vector.broadcast %172 : vector<4x1xf32> to vector<4x18xf32>
    %174 = arith.addf %171, %173 : vector<4x18xf32>
    %cst_58 = arith.constant 0.000000e+00 : f32
    %175 = vector.broadcast %cst_58 : f32 to vector<4x18xf32>
    %176 = arith.maximumf %174, %175 : vector<4x18xf32>
    %c0_59 = arith.constant 0 : index
    %c0_60 = arith.constant 0 : index
    %177 = vector.load %arg6[%c0_59, %c0_60] : memref<36x4xf32, #tpu.memory_space<vmem>>, vector<36x4xf32>
    %cst_61 = arith.constant dense<0.000000e+00> : vector<36x18xf32>
    %178 = tpu.matmul %177, %176, %cst_61 {dimension_numbers = #tpu.dot_dimension_numbers<[1], [0], [0], [1], [0, 0, 1, 1], [], []>} : vector<36x4xf32>, vector<4x18xf32>, vector<36x18xf32> -> vector<36x18xf32>
    %179 = vector.extract_strided_slice %178 {offsets = [0, 0], sizes = [4, 18], strides = [1, 1]} : vector<36x18xf32> to vector<4x18xf32>
    %c0_62 = arith.constant 0 : index
    %c0_63 = arith.constant 0 : index
    %c0_64 = arith.constant 0 : index
    %180 = vector.load %arg10[%c0_62, %c0_63, %c0_64] : memref<9x18x18xf32, #tpu.memory_space<vmem>>, vector<1x18x18xf32>
    %181 = vector.shape_cast %180 : vector<1x18x18xf32> to vector<18x18xf32>
    %cst_65 = arith.constant dense<0.000000e+00> : vector<4x18xf32>
    %182 = tpu.matmul %179, %181, %cst_65 {dimension_numbers = #tpu.dot_dimension_numbers<[1], [0], [0], [1], [0, 0, 1, 1], [], []>} : vector<4x18xf32>, vector<18x18xf32>, vector<4x18xf32> -> vector<4x18xf32>
    %183 = vector.extract_strided_slice %178 {offsets = [4, 0], sizes = [4, 18], strides = [1, 1]} : vector<36x18xf32> to vector<4x18xf32>
    %c1_66 = arith.constant 1 : index
    %c0_67 = arith.constant 0 : index
    %c0_68 = arith.constant 0 : index
    %184 = vector.load %arg10[%c1_66, %c0_67, %c0_68] : memref<9x18x18xf32, #tpu.memory_space<vmem>>, vector<1x18x18xf32>
    %185 = vector.shape_cast %184 : vector<1x18x18xf32> to vector<18x18xf32>
    %cst_69 = arith.constant dense<0.000000e+00> : vector<4x18xf32>
    %186 = tpu.matmul %183, %185, %cst_69 {dimension_numbers = #tpu.dot_dimension_numbers<[1], [0], [0], [1], [0, 0, 1, 1], [], []>} : vector<4x18xf32>, vector<18x18xf32>, vector<4x18xf32> -> vector<4x18xf32>
    %187 = arith.addf %182, %186 : vector<4x18xf32>
    %188 = vector.extract_strided_slice %178 {offsets = [8, 0], sizes = [4, 18], strides = [1, 1]} : vector<36x18xf32> to vector<4x18xf32>
    %c2_70 = arith.constant 2 : index
    %c0_71 = arith.constant 0 : index
    %c0_72 = arith.constant 0 : index
    %189 = vector.load %arg10[%c2_70, %c0_71, %c0_72] : memref<9x18x18xf32, #tpu.memory_space<vmem>>, vector<1x18x18xf32>
    %190 = vector.shape_cast %189 : vector<1x18x18xf32> to vector<18x18xf32>
    %cst_73 = arith.constant dense<0.000000e+00> : vector<4x18xf32>
    %191 = tpu.matmul %188, %190, %cst_73 {dimension_numbers = #tpu.dot_dimension_numbers<[1], [0], [0], [1], [0, 0, 1, 1], [], []>} : vector<4x18xf32>, vector<18x18xf32>, vector<4x18xf32> -> vector<4x18xf32>
    %192 = arith.addf %187, %191 : vector<4x18xf32>
    %193 = vector.extract_strided_slice %178 {offsets = [12, 0], sizes = [4, 18], strides = [1, 1]} : vector<36x18xf32> to vector<4x18xf32>
    %c3_74 = arith.constant 3 : index
    %c0_75 = arith.constant 0 : index
    %c0_76 = arith.constant 0 : index
    %194 = vector.load %arg10[%c3_74, %c0_75, %c0_76] : memref<9x18x18xf32, #tpu.memory_space<vmem>>, vector<1x18x18xf32>
    %195 = vector.shape_cast %194 : vector<1x18x18xf32> to vector<18x18xf32>
    %cst_77 = arith.constant dense<0.000000e+00> : vector<4x18xf32>
    %196 = tpu.matmul %193, %195, %cst_77 {dimension_numbers = #tpu.dot_dimension_numbers<[1], [0], [0], [1], [0, 0, 1, 1], [], []>} : vector<4x18xf32>, vector<18x18xf32>, vector<4x18xf32> -> vector<4x18xf32>
    %197 = arith.addf %192, %196 : vector<4x18xf32>
    %198 = vector.extract_strided_slice %178 {offsets = [16, 0], sizes = [4, 18], strides = [1, 1]} : vector<36x18xf32> to vector<4x18xf32>
    %c4_78 = arith.constant 4 : index
    %c0_79 = arith.constant 0 : index
    %c0_80 = arith.constant 0 : index
    %199 = vector.load %arg10[%c4_78, %c0_79, %c0_80] : memref<9x18x18xf32, #tpu.memory_space<vmem>>, vector<1x18x18xf32>
    %200 = vector.shape_cast %199 : vector<1x18x18xf32> to vector<18x18xf32>
    %cst_81 = arith.constant dense<0.000000e+00> : vector<4x18xf32>
    %201 = tpu.matmul %198, %200, %cst_81 {dimension_numbers = #tpu.dot_dimension_numbers<[1], [0], [0], [1], [0, 0, 1, 1], [], []>} : vector<4x18xf32>, vector<18x18xf32>, vector<4x18xf32> -> vector<4x18xf32>
    %202 = arith.addf %197, %201 : vector<4x18xf32>
    %203 = vector.extract_strided_slice %178 {offsets = [20, 0], sizes = [4, 18], strides = [1, 1]} : vector<36x18xf32> to vector<4x18xf32>
    %c5_82 = arith.constant 5 : index
    %c0_83 = arith.constant 0 : index
    %c0_84 = arith.constant 0 : index
    %204 = vector.load %arg10[%c5_82, %c0_83, %c0_84] : memref<9x18x18xf32, #tpu.memory_space<vmem>>, vector<1x18x18xf32>
    %205 = vector.shape_cast %204 : vector<1x18x18xf32> to vector<18x18xf32>
    %cst_85 = arith.constant dense<0.000000e+00> : vector<4x18xf32>
    %206 = tpu.matmul %203, %205, %cst_85 {dimension_numbers = #tpu.dot_dimension_numbers<[1], [0], [0], [1], [0, 0, 1, 1], [], []>} : vector<4x18xf32>, vector<18x18xf32>, vector<4x18xf32> -> vector<4x18xf32>
    %207 = arith.addf %202, %206 : vector<4x18xf32>
    %208 = vector.extract_strided_slice %178 {offsets = [24, 0], sizes = [4, 18], strides = [1, 1]} : vector<36x18xf32> to vector<4x18xf32>
    %c6_86 = arith.constant 6 : index
    %c0_87 = arith.constant 0 : index
    %c0_88 = arith.constant 0 : index
    %209 = vector.load %arg10[%c6_86, %c0_87, %c0_88] : memref<9x18x18xf32, #tpu.memory_space<vmem>>, vector<1x18x18xf32>
    %210 = vector.shape_cast %209 : vector<1x18x18xf32> to vector<18x18xf32>
    %cst_89 = arith.constant dense<0.000000e+00> : vector<4x18xf32>
    %211 = tpu.matmul %208, %210, %cst_89 {dimension_numbers = #tpu.dot_dimension_numbers<[1], [0], [0], [1], [0, 0, 1, 1], [], []>} : vector<4x18xf32>, vector<18x18xf32>, vector<4x18xf32> -> vector<4x18xf32>
    %212 = arith.addf %207, %211 : vector<4x18xf32>
    %213 = vector.extract_strided_slice %178 {offsets = [28, 0], sizes = [4, 18], strides = [1, 1]} : vector<36x18xf32> to vector<4x18xf32>
    %c7_90 = arith.constant 7 : index
    %c0_91 = arith.constant 0 : index
    %c0_92 = arith.constant 0 : index
    %214 = vector.load %arg10[%c7_90, %c0_91, %c0_92] : memref<9x18x18xf32, #tpu.memory_space<vmem>>, vector<1x18x18xf32>
    %215 = vector.shape_cast %214 : vector<1x18x18xf32> to vector<18x18xf32>
    %cst_93 = arith.constant dense<0.000000e+00> : vector<4x18xf32>
    %216 = tpu.matmul %213, %215, %cst_93 {dimension_numbers = #tpu.dot_dimension_numbers<[1], [0], [0], [1], [0, 0, 1, 1], [], []>} : vector<4x18xf32>, vector<18x18xf32>, vector<4x18xf32> -> vector<4x18xf32>
    %217 = arith.addf %212, %216 : vector<4x18xf32>
    %218 = vector.extract_strided_slice %178 {offsets = [32, 0], sizes = [4, 18], strides = [1, 1]} : vector<36x18xf32> to vector<4x18xf32>
    %c8_94 = arith.constant 8 : index
    %c0_95 = arith.constant 0 : index
    %c0_96 = arith.constant 0 : index
    %219 = vector.load %arg10[%c8_94, %c0_95, %c0_96] : memref<9x18x18xf32, #tpu.memory_space<vmem>>, vector<1x18x18xf32>
    %220 = vector.shape_cast %219 : vector<1x18x18xf32> to vector<18x18xf32>
    %cst_97 = arith.constant dense<0.000000e+00> : vector<4x18xf32>
    %221 = tpu.matmul %218, %220, %cst_97 {dimension_numbers = #tpu.dot_dimension_numbers<[1], [0], [0], [1], [0, 0, 1, 1], [], []>} : vector<4x18xf32>, vector<18x18xf32>, vector<4x18xf32> -> vector<4x18xf32>
    %222 = arith.addf %217, %221 : vector<4x18xf32>
    %c0_98 = arith.constant 0 : index
    %c0_99 = arith.constant 0 : index
    %223 = vector.load %arg7[%c0_98, %c0_99] : memref<4x1xf32, #tpu.memory_space<vmem>>, vector<4x1xf32>
    %224 = vector.broadcast %223 : vector<4x1xf32> to vector<4x18xf32>
    %225 = arith.addf %222, %224 : vector<4x18xf32>
    %cst_100 = arith.constant 0.000000e+00 : f32
    %226 = vector.broadcast %cst_100 : f32 to vector<4x18xf32>
    %227 = arith.maximumf %225, %226 : vector<4x18xf32>
    %c0_101 = arith.constant 0 : index
    %c0_102 = arith.constant 0 : index
    %228 = vector.load %arg8[%c0_101, %c0_102] : memref<36x4xf32, #tpu.memory_space<vmem>>, vector<36x4xf32>
    %cst_103 = arith.constant dense<0.000000e+00> : vector<36x18xf32>
    %229 = tpu.matmul %228, %227, %cst_103 {dimension_numbers = #tpu.dot_dimension_numbers<[1], [0], [0], [1], [0, 0, 1, 1], [], []>} : vector<36x4xf32>, vector<4x18xf32>, vector<36x18xf32> -> vector<36x18xf32>
    %230 = vector.extract_strided_slice %229 {offsets = [0, 0], sizes = [4, 18], strides = [1, 1]} : vector<36x18xf32> to vector<4x18xf32>
    %c0_104 = arith.constant 0 : index
    %c0_105 = arith.constant 0 : index
    %c0_106 = arith.constant 0 : index
    %231 = vector.load %arg10[%c0_104, %c0_105, %c0_106] : memref<9x18x18xf32, #tpu.memory_space<vmem>>, vector<1x18x18xf32>
    %232 = vector.shape_cast %231 : vector<1x18x18xf32> to vector<18x18xf32>
    %cst_107 = arith.constant dense<0.000000e+00> : vector<4x18xf32>
    %233 = tpu.matmul %230, %232, %cst_107 {dimension_numbers = #tpu.dot_dimension_numbers<[1], [0], [0], [1], [0, 0, 1, 1], [], []>} : vector<4x18xf32>, vector<18x18xf32>, vector<4x18xf32> -> vector<4x18xf32>
    %234 = vector.extract_strided_slice %229 {offsets = [4, 0], sizes = [4, 18], strides = [1, 1]} : vector<36x18xf32> to vector<4x18xf32>
    %c1_108 = arith.constant 1 : index
    %c0_109 = arith.constant 0 : index
    %c0_110 = arith.constant 0 : index
    %235 = vector.load %arg10[%c1_108, %c0_109, %c0_110] : memref<9x18x18xf32, #tpu.memory_space<vmem>>, vector<1x18x18xf32>
    %236 = vector.shape_cast %235 : vector<1x18x18xf32> to vector<18x18xf32>
    %cst_111 = arith.constant dense<0.000000e+00> : vector<4x18xf32>
    %237 = tpu.matmul %234, %236, %cst_111 {dimension_numbers = #tpu.dot_dimension_numbers<[1], [0], [0], [1], [0, 0, 1, 1], [], []>} : vector<4x18xf32>, vector<18x18xf32>, vector<4x18xf32> -> vector<4x18xf32>
    %238 = arith.addf %233, %237 : vector<4x18xf32>
    %239 = vector.extract_strided_slice %229 {offsets = [8, 0], sizes = [4, 18], strides = [1, 1]} : vector<36x18xf32> to vector<4x18xf32>
    %c2_112 = arith.constant 2 : index
    %c0_113 = arith.constant 0 : index
    %c0_114 = arith.constant 0 : index
    %240 = vector.load %arg10[%c2_112, %c0_113, %c0_114] : memref<9x18x18xf32, #tpu.memory_space<vmem>>, vector<1x18x18xf32>
    %241 = vector.shape_cast %240 : vector<1x18x18xf32> to vector<18x18xf32>
    %cst_115 = arith.constant dense<0.000000e+00> : vector<4x18xf32>
    %242 = tpu.matmul %239, %241, %cst_115 {dimension_numbers = #tpu.dot_dimension_numbers<[1], [0], [0], [1], [0, 0, 1, 1], [], []>} : vector<4x18xf32>, vector<18x18xf32>, vector<4x18xf32> -> vector<4x18xf32>
    %243 = arith.addf %238, %242 : vector<4x18xf32>
    %244 = vector.extract_strided_slice %229 {offsets = [12, 0], sizes = [4, 18], strides = [1, 1]} : vector<36x18xf32> to vector<4x18xf32>
    %c3_116 = arith.constant 3 : index
    %c0_117 = arith.constant 0 : index
    %c0_118 = arith.constant 0 : index
    %245 = vector.load %arg10[%c3_116, %c0_117, %c0_118] : memref<9x18x18xf32, #tpu.memory_space<vmem>>, vector<1x18x18xf32>
    %246 = vector.shape_cast %245 : vector<1x18x18xf32> to vector<18x18xf32>
    %cst_119 = arith.constant dense<0.000000e+00> : vector<4x18xf32>
    %247 = tpu.matmul %244, %246, %cst_119 {dimension_numbers = #tpu.dot_dimension_numbers<[1], [0], [0], [1], [0, 0, 1, 1], [], []>} : vector<4x18xf32>, vector<18x18xf32>, vector<4x18xf32> -> vector<4x18xf32>
    %248 = arith.addf %243, %247 : vector<4x18xf32>
    %249 = vector.extract_strided_slice %229 {offsets = [16, 0], sizes = [4, 18], strides = [1, 1]} : vector<36x18xf32> to vector<4x18xf32>
    %c4_120 = arith.constant 4 : index
    %c0_121 = arith.constant 0 : index
    %c0_122 = arith.constant 0 : index
    %250 = vector.load %arg10[%c4_120, %c0_121, %c0_122] : memref<9x18x18xf32, #tpu.memory_space<vmem>>, vector<1x18x18xf32>
    %251 = vector.shape_cast %250 : vector<1x18x18xf32> to vector<18x18xf32>
    %cst_123 = arith.constant dense<0.000000e+00> : vector<4x18xf32>
    %252 = tpu.matmul %249, %251, %cst_123 {dimension_numbers = #tpu.dot_dimension_numbers<[1], [0], [0], [1], [0, 0, 1, 1], [], []>} : vector<4x18xf32>, vector<18x18xf32>, vector<4x18xf32> -> vector<4x18xf32>
    %253 = arith.addf %248, %252 : vector<4x18xf32>
    %254 = vector.extract_strided_slice %229 {offsets = [20, 0], sizes = [4, 18], strides = [1, 1]} : vector<36x18xf32> to vector<4x18xf32>
    %c5_124 = arith.constant 5 : index
    %c0_125 = arith.constant 0 : index
    %c0_126 = arith.constant 0 : index
    %255 = vector.load %arg10[%c5_124, %c0_125, %c0_126] : memref<9x18x18xf32, #tpu.memory_space<vmem>>, vector<1x18x18xf32>
    %256 = vector.shape_cast %255 : vector<1x18x18xf32> to vector<18x18xf32>
    %cst_127 = arith.constant dense<0.000000e+00> : vector<4x18xf32>
    %257 = tpu.matmul %254, %256, %cst_127 {dimension_numbers = #tpu.dot_dimension_numbers<[1], [0], [0], [1], [0, 0, 1, 1], [], []>} : vector<4x18xf32>, vector<18x18xf32>, vector<4x18xf32> -> vector<4x18xf32>
    %258 = arith.addf %253, %257 : vector<4x18xf32>
    %259 = vector.extract_strided_slice %229 {offsets = [24, 0], sizes = [4, 18], strides = [1, 1]} : vector<36x18xf32> to vector<4x18xf32>
    %c6_128 = arith.constant 6 : index
    %c0_129 = arith.constant 0 : index
    %c0_130 = arith.constant 0 : index
    %260 = vector.load %arg10[%c6_128, %c0_129, %c0_130] : memref<9x18x18xf32, #tpu.memory_space<vmem>>, vector<1x18x18xf32>
    %261 = vector.shape_cast %260 : vector<1x18x18xf32> to vector<18x18xf32>
    %cst_131 = arith.constant dense<0.000000e+00> : vector<4x18xf32>
    %262 = tpu.matmul %259, %261, %cst_131 {dimension_numbers = #tpu.dot_dimension_numbers<[1], [0], [0], [1], [0, 0, 1, 1], [], []>} : vector<4x18xf32>, vector<18x18xf32>, vector<4x18xf32> -> vector<4x18xf32>
    %263 = arith.addf %258, %262 : vector<4x18xf32>
    %264 = vector.extract_strided_slice %229 {offsets = [28, 0], sizes = [4, 18], strides = [1, 1]} : vector<36x18xf32> to vector<4x18xf32>
    %c7_132 = arith.constant 7 : index
    %c0_133 = arith.constant 0 : index
    %c0_134 = arith.constant 0 : index
    %265 = vector.load %arg10[%c7_132, %c0_133, %c0_134] : memref<9x18x18xf32, #tpu.memory_space<vmem>>, vector<1x18x18xf32>
    %266 = vector.shape_cast %265 : vector<1x18x18xf32> to vector<18x18xf32>
    %cst_135 = arith.constant dense<0.000000e+00> : vector<4x18xf32>
    %267 = tpu.matmul %264, %266, %cst_135 {dimension_numbers = #tpu.dot_dimension_numbers<[1], [0], [0], [1], [0, 0, 1, 1], [], []>} : vector<4x18xf32>, vector<18x18xf32>, vector<4x18xf32> -> vector<4x18xf32>
    %268 = arith.addf %263, %267 : vector<4x18xf32>
    %269 = vector.extract_strided_slice %229 {offsets = [32, 0], sizes = [4, 18], strides = [1, 1]} : vector<36x18xf32> to vector<4x18xf32>
    %c8_136 = arith.constant 8 : index
    %c0_137 = arith.constant 0 : index
    %c0_138 = arith.constant 0 : index
    %270 = vector.load %arg10[%c8_136, %c0_137, %c0_138] : memref<9x18x18xf32, #tpu.memory_space<vmem>>, vector<1x18x18xf32>
    %271 = vector.shape_cast %270 : vector<1x18x18xf32> to vector<18x18xf32>
    %cst_139 = arith.constant dense<0.000000e+00> : vector<4x18xf32>
    %272 = tpu.matmul %269, %271, %cst_139 {dimension_numbers = #tpu.dot_dimension_numbers<[1], [0], [0], [1], [0, 0, 1, 1], [], []>} : vector<4x18xf32>, vector<18x18xf32>, vector<4x18xf32> -> vector<4x18xf32>
    %273 = arith.addf %268, %272 : vector<4x18xf32>
    %c0_140 = arith.constant 0 : index
    %c0_141 = arith.constant 0 : index
    %274 = vector.load %arg9[%c0_140, %c0_141] : memref<4x1xf32, #tpu.memory_space<vmem>>, vector<4x1xf32>
    %275 = vector.broadcast %274 : vector<4x1xf32> to vector<4x18xf32>
    %276 = arith.addf %273, %275 : vector<4x18xf32>
    %c0_142 = arith.constant 0 : index
    %c0_143 = arith.constant 0 : index
    %277 = vector.load %arg13[%c0_142, %c0_143] : memref<16x4xf32, #tpu.memory_space<vmem>>, vector<16x4xf32>
    %cst_144 = arith.constant dense<0.000000e+00> : vector<16x18xf32>
    %278 = tpu.matmul %277, %276, %cst_144 {dimension_numbers = #tpu.dot_dimension_numbers<[1], [0], [0], [1], [0, 0, 1, 1], [], []>} : vector<16x4xf32>, vector<4x18xf32>, vector<16x18xf32> -> vector<16x18xf32>
    %c0_145 = arith.constant 0 : index
    %c0_146 = arith.constant 0 : index
    %279 = vector.load %arg12[%c0_145, %c0_146] : memref<16x16xf32, #tpu.memory_space<vmem>>, vector<16x16xf32>
    %cst_147 = arith.constant dense<0.000000e+00> : vector<16x2048xf32>
    %280 = tpu.matmul %279, %0, %cst_147 {dimension_numbers = #tpu.dot_dimension_numbers<[1], [0], [0], [1], [0, 0, 1, 1], [], []>} : vector<16x16xf32>, vector<16x2048xf32>, vector<16x2048xf32> -> vector<16x2048xf32>
    %c0_148 = arith.constant 0 : index
    %c0_149 = arith.constant 0 : index
    %281 = vector.load %arg11[%c0_148, %c0_149] : memref<18x2048xf32, #tpu.memory_space<vmem>>, vector<18x2048xf32>
    %cst_150 = arith.constant dense<0.000000e+00> : vector<16x2048xf32>
    %282 = tpu.matmul %278, %281, %cst_150 {dimension_numbers = #tpu.dot_dimension_numbers<[1], [0], [0], [1], [0, 0, 1, 1], [], []>} : vector<16x18xf32>, vector<18x2048xf32>, vector<16x2048xf32> -> vector<16x2048xf32>
    %283 = arith.addf %280, %282 : vector<16x2048xf32>
    %c0_151 = arith.constant 0 : index
    %c0_152 = arith.constant 0 : index
    %284 = vector.load %arg14[%c0_151, %c0_152] : memref<16x1xf32, #tpu.memory_space<vmem>>, vector<16x1xf32>
    %285 = vector.broadcast %284 : vector<16x1xf32> to vector<16x2048xf32>
    %286 = arith.addf %283, %285 : vector<16x2048xf32>
    %cst_153 = arith.constant 5.000000e-01 : f32
    %287 = vector.broadcast %cst_153 : f32 to vector<16x2048xf32>
    %288 = arith.mulf %287, %286 : vector<16x2048xf32>
    %289 = math.tanh %288 : vector<16x2048xf32>
    %cst_154 = arith.constant 1.000000e+00 : f32
    %290 = vector.broadcast %cst_154 : f32 to vector<16x2048xf32>
    %291 = arith.addf %290, %289 : vector<16x2048xf32>
    %cst_155 = arith.constant 5.000000e-01 : f32
    %292 = vector.broadcast %cst_155 : f32 to vector<16x2048xf32>
    %293 = arith.mulf %292, %291 : vector<16x2048xf32>
    %294 = arith.mulf %0, %293 : vector<16x2048xf32>
    %c0_156 = arith.constant 0 : index
    %c0_157 = arith.constant 0 : index
    %295 = vector.load %arg15[%c0_156, %c0_157] : memref<16x2048xf32, #tpu.memory_space<vmem>>, vector<16x2048xf32>
    tpu.vector_store %arg15[%c0_156, %c0_157], %294 {strides = array<i32>} : memref<16x2048xf32, #tpu.memory_space<vmem>>, vector<16x2048xf32>,
    return
  }
}

</mosaic_0001>

<bundles_post_ra>
// kernel: esa_forward.1
= control target key start
LH: loop header
LB: loop body
LE: loop exit
PB: predicated region body
PF: predicated region fallthrough
CT: control target
= control target key end

     0   :  { %v5261_v3 = vmov 0   ;;  %vm163_vm0 = vcmask 130048   ;;  %s5262_s30 = smov 98   ;;  %s5264_s16 = smov 83   ;;  %vm460_vm1 = vcmask 556032   ;;  %vm480_vm2 = vcmask 585224   ;;  %s6824_s1 = inlined_call_operand.vmem [shape: f32[144,450], index: 1, kind: input, shape index: {}]   ;;  %s6825_s2 = inlined_call_operand.vmem [shape: f32[4,144], index: 2, kind: input, shape index: {}]   ;;  %s6826_s3 = inlined_call_operand.vmem [shape: f32[4,1], index: 3, kind: input, shape index: {}]   ;;  %s6827_s5 = inlined_call_operand.vmem [shape: f32[4,1], index: 5, kind: input, shape index: {}]   ;;  %s6828_s14 = inlined_call_operand.vmem [shape: f32[16,1], index: 14, kind: input, shape index: {}]   ;;  %s6829_s10 = inlined_call_operand.vmem [shape: f32[9,18,18], index: 10, kind: input, shape index: {}]   ;;  %s6830_s4 = inlined_call_operand.vmem [shape: f32[36,4], index: 4, kind: input, shape index: {}]   ;;  %s6831_s6 = inlined_call_operand.vmem [shape: f32[36,4], index: 6, kind: input, shape index: {}]   ;;  %s6832_s7 = inlined_call_operand.vmem [shape: f32[4,1], index: 7, kind: input, shape index: {}]   ;;  %s6833_s9 = inlined_call_operand.vmem [shape: f32[4,1], index: 9, kind: input, shape index: {}]   ;;  %s6834_s8 = inlined_call_operand.vmem [shape: f32[36,4], index: 8, kind: input, shape index: {}]   ;;  %s6835_s13 = inlined_call_operand.vmem [shape: f32[16,4], index: 13, kind: input, shape index: {}]   ;;  %s6836_s11 = inlined_call_operand.vmem [shape: f32[18,2048], index: 11, kind: input, shape index: {}]   ;;  %s6837_s0 = inlined_call_operand.vmem [shape: f32[16,2048], index: 0, kind: input, shape index: {}]   ;;  %s6838_s12 = inlined_call_operand.vmem [shape: f32[16,16], index: 12, kind: input, shape index: {}]   ;;  %s6839_s15 = inlined_call_operand.vmem [shape: f32[16,2048], index: 15, kind: output, shape index: {}]  }
   0x1   :  { %v144_v0 = vld [vmem:[%s6824_s1 + $0x1e8] sm:$0xff]  ;;  %v146_v1 = vld [vmem:[%s6824_s1 + $0x1f8] sm:$0xff]  ;;  %v143_v2 = vld [vmem:[%s6824_s1 + $0x1e0] sm:$0xff]  ;;  %5194 = vset.pattern.permute.xlu0 %v5261_v3  ;;  %5195 = vset.pattern.permute.xlu1 %v5261_v3  ;;  %s5265_s17 = smov 68   ;;  %s5267_s18 = smov 38   ;;  %vm476_vm3 = vcmask 560624  }
   0x2   :  { %166 = vmatprep.subr.mxu0 %v144_v0  ;;  %237 = vmatprep.subr.mxu1 %v146_v1  ;;  %v145_v4 = vld [vmem:[%s6824_s1 + $0x1f0] sm:$0xff]  ;;  %v140_v5 = vld [vmem:[%s6824_s1 + $0x1c8] sm:$0xff]  ;;  %v142_v6 = vld [vmem:[%s6824_s1 + $0x1d8] sm:$0xff]  ;;  %vm341_vm4 = vcmask 101424   ;;  %vm333_vm5 = vcmask 52224   ;;  %vm337_vm6 = vcmask 76824  }
   0x3   :  { %167 = vmatpush1.msra.mxu0 %v143_v2  ;;  %238 = vmatpush1.msra.mxu1 %v145_v4  ;;  %v139_v7 = vld [vmem:[%s6824_s1 + $0x1c0] sm:$0xff]  ;;  %v141_v8 = vld [vmem:[%s6824_s1 + $0x1d0] sm:$0xff]  ;;  %v136_v9 = vld [vmem:[%s6824_s1 + $0x1a8] sm:$0xff]  ;;  %vm370_vm7 = vcmask 801792   ;;  %vm348_vm8 = vcmask 433152   ;;  %vm360_vm9 = vcmask 445824  }
   0x4   :  { %168 = vmatprep.subr.mxu0 %v140_v5  ;;  %239 = vmatprep.subr.mxu1 %v142_v6  ;;  %v138_v10 = vld [vmem:[%s6824_s1 + $0x1b8] sm:$0xff]  ;;  %v135_v11 = vld [vmem:[%s6824_s1 + $0x1a0] sm:$0xff]  ;;  %v137_v12 = vld [vmem:[%s6824_s1 + $0x1b0] sm:$0xff]  ;;  %vm356_vm10 = vcmask 421224   ;;  %vm364_vm11 = vcmask 470424   ;;  %vm445_vm12 = vcmask 167024  }
   0x5   :  { %169 = vmatpush1.msra.mxu0 %v139_v7  ;;  %240 = vmatpush1.msra.mxu1 %v141_v8  ;;  %v132_v13 = vld [vmem:[%s6824_s1 + $0x188] sm:$0xff]  ;;  %v134_v14 = vld [vmem:[%s6824_s1 + $0x198] sm:$0xff]  ;;  %v131_v15 = vld [vmem:[%s6824_s1 + $0x180] sm:$0xff]  ;;  %vm449_vm13 = vcmask 191624   ;;  %vm453_vm14 = vcmask 216224   ;;  %vm389_vm15 = vcmask 814824  }
   0x6   :  { %170 = vmatprep.subr.mxu0 %v136_v9  ;;  %241 = vmatprep.subr.mxu1 %v138_v10  ;;  %v133_v16 = vld [vmem:[%s6824_s1 + $0x190] sm:$0xff]  ;;  %v128_v17 = vld [vmem:[%s6824_s1 + $0x168] sm:$0xff]  ;;  %v130_v18 = vld [vmem:[%s6824_s1 + $0x178] sm:$0xff] }
   0x7   :  { %171 = vmatpush1.msra.mxu0 %v135_v11  ;;  %242 = vmatpush1.msra.mxu1 %v137_v12  ;;  %v127_v19 = vld [vmem:[%s6824_s1 + $0x160] sm:$0xff]  ;;  %v129_v20 = vld [vmem:[%s6824_s1 + $0x170] sm:$0xff]  ;;  %v124_v21 = vld [vmem:[%s6824_s1 + $0x148] sm:$0xff] }
   0x8   :  { %172 = vmatprep.subr.mxu0 %v132_v13  ;;  %243 = vmatprep.subr.mxu1 %v134_v14  ;;  %v126_v22 = vld [vmem:[%s6824_s1 + $0x158] sm:$0xff]  ;;  %v123_v23 = vld [vmem:[%s6824_s1 + $0x140] sm:$0xff]  ;;  %v125_v24 = vld [vmem:[%s6824_s1 + $0x150] sm:$0xff] }
   0x9   :  { %173 = vmatpush1.msra.mxu0 %v131_v15  ;;  %244 = vmatpush1.msra.mxu1 %v133_v16  ;;  %v120_v25 = vld [vmem:[%s6824_s1 + $0x128] sm:$0xff]  ;;  %v122_v26 = vld [vmem:[%s6824_s1 + $0x138] sm:$0xff]  ;;  %v119_v27 = vld [vmem:[%s6824_s1 + $0x120] sm:$0xff] }
   0xa   :  { %174 = vmatprep.subr.mxu0 %v128_v17  ;;  %245 = vmatprep.subr.mxu1 %v130_v18  ;;  %v121_v28 = vld [vmem:[%s6824_s1 + $0x130] sm:$0xff]  ;;  %v116_v29 = vld [vmem:[%s6824_s1 + $0x108] sm:$0xff]  ;;  %v118_v30 = vld [vmem:[%s6824_s1 + $0x118] sm:$0xff] }
   0xb   :  { %175 = vmatpush1.msra.mxu0 %v127_v19  ;;  %246 = vmatpush1.msra.mxu1 %v129_v20  ;;  %v115_v31 = vld [vmem:[%s6824_s1 + $0x100] sm:$0xff]  ;;  %v117_v32 = vld [vmem:[%s6824_s1 + $0x110] sm:$0xff]  ;;  %v112_v33 = vld [vmem:[%s6824_s1 + $0xe8] sm:$0xff] }
   0xc   :  { %176 = vmatprep.subr.mxu0 %v124_v21  ;;  %247 = vmatprep.subr.mxu1 %v126_v22  ;;  %v114_v34 = vld [vmem:[%s6824_s1 + $0xf8] sm:$0xff]  ;;  %v111_v35 = vld [vmem:[%s6824_s1 + $0xe0] sm:$0xff]  ;;  %v113_v36 = vld [vmem:[%s6824_s1 + $0xf0] sm:$0xff] }
   0xd   :  { %177 = vmatpush1.msra.mxu0 %v123_v23  ;;  %248 = vmatpush1.msra.mxu1 %v125_v24  ;;  %v108_v37 = vld [vmem:[%s6824_s1 + $0xc8] sm:$0xff]  ;;  %v110_v38 = vld [vmem:[%s6824_s1 + $0xd8] sm:$0xff]  ;;  %v107_v39 = vld [vmem:[%s6824_s1 + $0xc0] sm:$0xff] }
   0xe   :  { %178 = vmatprep.subr.mxu0 %v120_v25  ;;  %249 = vmatprep.subr.mxu1 %v122_v26  ;;  %v109_v40 = vld [vmem:[%s6824_s1 + $0xd0] sm:$0xff]  ;;  %v104_v41 = vld [vmem:[%s6824_s1 + $0xa8] sm:$0xff]  ;;  %v106_v42 = vld [vmem:[%s6824_s1 + $0xb8] sm:$0xff] }
   0xf   :  { %179 = vmatpush1.msra.mxu0 %v119_v27  ;;  %250 = vmatpush1.msra.mxu1 %v121_v28  ;;  %v103_v43 = vld [vmem:[%s6824_s1 + $0xa0] sm:$0xff]  ;;  %v105_v44 = vld [vmem:[%s6824_s1 + $0xb0] sm:$0xff]  ;;  %v100_v45 = vld [vmem:[%s6824_s1 + $0x88] sm:$0xff] }
  0x10   :  { %180 = vmatprep.subr.mxu0 %v116_v29  ;;  %251 = vmatprep.subr.mxu1 %v118_v30  ;;  %v102_v46 = vld [vmem:[%s6824_s1 + $0x98] sm:$0xff]  ;;  %v99_v47 = vld [vmem:[%s6824_s1 + $0x80] sm:$0xff]  ;;  %v101_v48 = vld [vmem:[%s6824_s1 + $0x90] sm:$0xff] }
  0x11   :  { %181 = vmatpush1.msra.mxu0 %v115_v31  ;;  %252 = vmatpush1.msra.mxu1 %v117_v32  ;;  %v96_v49 = vld [vmem:[%s6824_s1 + $0x68] sm:$0xff]  ;;  %v98_v50 = vld [vmem:[%s6824_s1 + $0x78] sm:$0xff]  ;;  %v95_v51 = vld [vmem:[%s6824_s1 + $0x60] sm:$0xff] }
  0x12   :  { %182 = vmatprep.subr.mxu0 %v112_v33  ;;  %253 = vmatprep.subr.mxu1 %v114_v34  ;;  %v97_v52 = vld [vmem:[%s6824_s1 + $0x70] sm:$0xff]  ;;  %v92_v53 = vld [vmem:[%s6824_s1 + $0x48] sm:$0xff]  ;;  %v94_v54 = vld [vmem:[%s6824_s1 + $0x58] sm:$0xff] }
  0x13   :  { %183 = vmatpush1.msra.mxu0 %v111_v35  ;;  %254 = vmatpush1.msra.mxu1 %v113_v36  ;;  %v91_v55 = vld [vmem:[%s6824_s1 + $0x40] sm:$0xff]  ;;  %v93_v56 = vld [vmem:[%s6824_s1 + $0x50] sm:$0xff]  ;;  %v88_v57 = vld [vmem:[%s6824_s1 + $0x28] sm:$0xff] }
  0x14   :  { %184 = vmatprep.subr.mxu0 %v108_v37  ;;  %255 = vmatprep.subr.mxu1 %v110_v38  ;;  %v90_v58 = vld [vmem:[%s6824_s1 + $0x38] sm:$0xff]  ;;  %v87_v59 = vld [vmem:[%s6824_s1 + $0x20] sm:$0xff]  ;;  %v89_v60 = vld [vmem:[%s6824_s1 + $0x30] sm:$0xff] }
  0x15   :  { %185 = vmatpush1.msra.mxu0 %v107_v39  ;;  %256 = vmatpush1.msra.mxu1 %v109_v40  ;;  %v84_v61 = vld [vmem:[%s6824_s1 + $0x8] sm:$0xff]  ;;  %v86_v62 = vld [vmem:[%s6824_s1 + $0x18] sm:$0xff]  ;;  %v83_v63 = vld [vmem:[%s6824_s1] sm:$0xff] }
  0x16   :  { %186 = vmatprep.subr.mxu0 %v104_v41  ;;  %257 = vmatprep.subr.mxu1 %v106_v42  ;;  %v85_v0 = vld [vmem:[%s6824_s1 + $0x10] sm:$0xff]  ;;  %v82_v1 = vld [vmem:[%s6825_s2] sm:$0xff]  ;;  %v152_v2 = vld [vmem:[%s6824_s1 + $0x228] sm:$0xff] }
  0x17   :  { %187 = vmatpush1.msra.mxu0 %v103_v43  ;;  %258 = vmatpush1.msra.mxu1 %v105_v44  ;;  %v154_v3 = vld [vmem:[%s6824_s1 + $0x238] sm:$0xff]  ;;  %v151_v4 = vld [vmem:[%s6824_s1 + $0x220] sm:$0xff]  ;;  %v153_v5 = vld [vmem:[%s6824_s1 + $0x230] sm:$0xff]  ;;  %v162_v8 = vcombine.high %v82_v1, %v82_v1 }
  0x18   :  { %188 = vmatprep.subr.mxu0 %v100_v45  ;;  %259 = vmatprep.subr.mxu1 %v102_v46  ;;  %v148_v6 = vld [vmem:[%s6824_s1 + $0x208] sm:$0xff]  ;;  %v150_v7 = vld [vmem:[%s6824_s1 + $0x218] sm:$0xff]  ;;  %v147_v9 = vld [vmem:[%s6824_s1 + $0x200] sm:$0xff] }
  0x19   :  { %189 = vmatpush1.msra.mxu0 %v99_v47  ;;  %260 = vmatpush1.msra.mxu1 %v101_v48  ;;  %v149_v10 = vld [vmem:[%s6824_s1 + $0x210] sm:$0xff]  ;;  %v155_v11 = vld [vmem:[%s6826_s3] sm:$0xf]  ;;  %s5263_s1 = smov 113   ;;  %s5266_s3 = smov 53  }
  0x1a   :  { %190 = vmatprep.subr.mxu0 %v96_v49  ;;  %261 = vmatprep.subr.mxu1 %v98_v50 }
  0x1b   :  { %191 = vmatpush1.msra.mxu0 %v95_v51  ;;  %262 = vmatpush1.msra.mxu1 %v97_v52 }
  0x1c   :  { %192 = vmatprep.subr.mxu0 %v92_v53  ;;  %263 = vmatprep.subr.mxu1 %v94_v54 }
  0x1d   :  { %193 = vmatpush1.msra.mxu0 %v91_v55  ;;  %264 = vmatpush1.msra.mxu1 %v93_v56 }
  0x1e   :  { %194 = vmatprep.subr.mxu0 %v88_v57  ;;  %265 = vmatprep.subr.mxu1 %v90_v58 }
  0x1f   :  { %195 = vmatpush1.msra.mxu0 %v87_v59  ;;  %266 = vmatpush1.msra.mxu1 %v89_v60 }
  0x20   :  { %196 = vmatprep.subr.mxu0 %v84_v61  ;;  %267 = vmatprep.subr.mxu1 %v86_v62 }
  0x21   :  { %197 = vmatpush1.msra.mxu0 %v83_v63  ;;  %268 = vmatpush1.msra.mxu1 %v85_v0 }
  0x22   :  { %226 = vmatprep.subr.mxu0 %v152_v2  ;;  %297 = vmatprep.subr.mxu1 %v154_v3 }
  0x23   :  { %227 = vmatpush2.msra.mxu0 %v151_v4  ;;  %298 = vmatpush2.msra.mxu1 %v153_v5 }
  0x24   :  { %228 = vmatprep.subr.mxu0 %v148_v6  ;;  %299 = vmatprep.subr.mxu1 %v150_v7 }
  0x25   :  { %229 = vmatpush2.msra.mxu0 %v147_v9  ;;  %4607 = vmatprep.mubr.msk.f32.mxu0 %vm163_vm0, %v162_v8 }
  0x26   :  { %300 = vmatpush2.msra.mxu1 %v149_v10  ;;  %4608 = vmatprep.mubr.msk.f32.mxu1 %vm163_vm0, %v162_v8 }
  0x27   :  { %231 = vmatmul.mubr.f32.vlgmr.msra.gmra.mxu0 %v82_v1  ;;  %302 = vmatmul.mubr.f32.vlgmr.msra.gmra.mxu1 %v82_v1 }
  0x28   :  { %158 = vperm.xlu0 %5194, %v155_v11  }
  0xa3   :  { %v159_v12 = vpop.permute.xlu0 %158 }
  0xe7   :  { %v303_v13 = vpop.f32.mrf.mxu1  ;;  %v232_v17 = vpop.f32.mrf.mxu0 }
  0xe8   :  { %v304_v14 = vadd.f32 %v303_v13, %v159_v12  ;;  %v233_v18 = vadd.f32 %v232_v17, %v159_v12 }
  0xe9   :  { %v305_v15 = vpop.f32.mrf.mxu1  ;;  %v234_v19 = vpop.f32.mrf.mxu0 }
  0xea   :  { %402 = vrot.lane.b32.xlu1 %v304_v14, %s5262_s30  ;;  %435 = vrot.lane.b32.xlu0 %v304_v14, %s5263_s1  ;;  %v306_v16 = vadd.f32 %v305_v15, %v159_v12  ;;  %v5575_v20 = vadd.f32 %v234_v19, %v159_v12 }
  0xee   :  { %407 = vrot.lane.b32.xlu1 %v304_v14, %s5264_s16  ;;  %411 = vrot.lane.b32.xlu0 %v304_v14, %s5265_s17 }
  0xf2   :  { %458 = vrot.lane.b32.xlu1 %v306_v16, %s5265_s17  ;;  %464 = vrot.lane.b32.xlu0 %v306_v16, %s5266_s3 }
  0xf6   :  { %468 = vrot.lane.b32.xlu1 %v306_v16, %s5267_s18  ;;  %309 = vrot.lane.b32.xlu0 %v233_v18, %s5263_s1 }
  0xfa   :  { %313 = vrot.lane.b32.xlu1 %v233_v18, %s5262_s30  ;;  %317 = vrot.lane.b32.xlu0 %v233_v18, %s5264_s16 }
  0xfe   :  { %321 = vrot.lane.b32.xlu1 %v233_v18, %s5265_s17  ;;  %415 = vrot.lane.b32.xlu0 %v304_v14, %s5266_s3 }
 0x102   :  { %325 = vrot.lane.b32.xlu1 %v233_v18, %s5266_s3  ;;  %368 = vrot.lane.b32.xlu0 %v5575_v20, %s5262_s30 }
 0x106   :  { %329 = vrot.lane.b32.xlu1 %v233_v18, %s5267_s18  ;;  %397 = vrot.lane.b32.xlu0 %v5575_v20, %s5263_s1 }
 0x10a   :  { %419 = vrot.lane.b32.xlu1 %v304_v14, %s5267_s18  ;;  %374 = vrot.lane.b32.xlu0 %v5575_v20, %s5264_s16 }
 0x10e   :  { %346 = vrot.lane.b32.xlu1 %v5575_v20, %s5266_s3  ;;  %378 = vrot.lane.b32.xlu0 %v5575_v20, %s5265_s17 }
 0x112   :  { %352 = vrot.lane.b32.xlu1 %v5575_v20, %s5267_s18 }
 0x15c   :  { %v403_v21 = vpop.permute.xlu1 %402  ;;  %v436_v22 = vpop.permute.xlu0 %435 }
 0x15d   :  { %v438_v23 = vmax.f32 %v304_v14, %v436_v22 }
 0x15f   :  { %v440_v24 = vmax.f32 %v438_v23, %v403_v21 }
 0x160   :  { %v5583_v25 = vpop.permute.xlu1 %407  ;;  %v5585_v26 = vpop.permute.xlu0 %411 }
 0x161   :  { %v441_v27 = vmax.f32 %v440_v24, %v5583_v25 }
 0x163   :  { %v442_v0 = vmax.f32 %v441_v27, %v5585_v26 }
 0x164   :  { %v459_v28 = vpop.permute.xlu1 %458  ;;  %v465_v29 = vpop.permute.xlu0 %464 }
 0x165   :  { %v461_v30 = vsel %vm460_vm1, %v5585_v26, %v459_v28  ;;  %vm385_vm1 = vcmask 790224   ;;  %v1362_v28 = vld [vmem:[%s6827_s5] sm:$0xf]  ;;  %s5270_s5 = smov 16  }
 0x166   :  { %v463_v31 = vmax.f32 %v441_v27, %v461_v30  ;;  %v5268_v30 = vmov 0.0  }
 0x167   :  { %4885 = vmatprep.subr.mxu0 %v5268_v30  ;;  %4902 = vmatprep.subr.mxu1 %v5268_v30 }
 0x168   :  { %v467_v32 = vmax.f32 %v463_v31, %v465_v29  ;;  %v469_v33 = vpop.permute.xlu1 %468  ;;  %v310_v34 = vpop.permute.xlu0 %309  ;;  %v4367_v29 = vld [vmem:[%s6828_s14] sm:$0xff] }
 0x169   :  { %v312_v36 = vmax.f32 %v233_v18, %v310_v34  ;;  %v5618_v34 = vld [vmem:[%s6829_s10 + $0x28] sm:$0x3] }
 0x16a   :  { %v5589_v35 = vmax.f32 %v467_v32, %v469_v33 }
 0x16c   :  { %v314_v37 = vpop.permute.xlu1 %313  ;;  %v318_v38 = vpop.permute.xlu0 %317  ;;  %v481_v39 = vsel %vm480_vm2, %v5589_v35, -inf  ;;  %v477_v40 = vsel %vm476_vm3, %v5589_v35, -inf  ;;  %vm423_vm2 = vcmask 847624   ;;  %vm393_vm3 = vcmask 839424  }
 0x16d   :  { %v316_v41 = vmax.f32 %v312_v36, %v314_v37  ;;  %482 = vmax.xlane.f32.xlu1 %v481_v39  ;;  %478 = vmax.xlane.f32.xlu0 %v477_v40 }
 0x16f   :  { %v320_v44 = vmax.f32 %v316_v41, %v318_v38 }
 0x170   :  { %v322_v42 = vpop.permute.xlu1 %321  ;;  %v5593_v43 = vpop.permute.xlu0 %415 }
 0x171   :  { %v324_v47 = vmax.f32 %v320_v44, %v322_v42  ;;  %v443_v4 = vmax.f32 %v442_v0, %v5593_v43 }
 0x174   :  { %v326_v45 = vpop.permute.xlu1 %325  ;;  %v369_v46 = vpop.permute.xlu0 %368 }
 0x175   :  { %v328_v48 = vmax.f32 %v324_v47, %v326_v45  ;;  %v371_v58 = vsel %vm370_vm7, %v314_v37, %v369_v46  ;;  %v404_v60 = vsel %vm370_vm7, %v369_v46, %v403_v21  ;;  %vm5269_vm7 = vmmov 0  }
 0x176   :  { %v373_v1 = vmax.f32 %v312_v36, %v371_v58  ;;  %4887 = vmatprep.mubr.msk.f32.mxu0 %vm5269_vm7, %v5268_v30  ;;  %4908 = vmatprep.mubr.msk.f32.mxu1 %vm5269_vm7, %v5268_v30 }
 0x178   :  { %v330_v49 = vpop.permute.xlu1 %329  ;;  %v398_v50 = vpop.permute.xlu0 %397 }
 0x179   :  { %v332_v51 = vmax.f32 %v328_v48, %v330_v49  ;;  %v400_v55 = vmax.f32 %v5575_v20, %v398_v50 }
 0x17b   :  { %v342_v52 = vsel %vm341_vm4, %v332_v51, -inf  ;;  %v334_v53 = vsel %vm333_vm5, %v332_v51, -inf  ;;  %v338_v57 = vsel %vm337_vm6, %v332_v51, -inf  ;;  %v406_v62 = vmax.f32 %v400_v55, %v404_v60 }
 0x17c   :  { %v420_v54 = vpop.permute.xlu1 %419  ;;  %343 = vmax.xlane.f32.xlu1 %v342_v52  ;;  %335 = vmax.xlane.f32.xlu0 %v334_v53  ;;  %v375_v56 = vpop.permute.xlu0 %374  ;;  %vm431_vm4 = vcmask 896824   ;;  %vm427_vm5 = vcmask 872224   ;;  %vm472_vm6 = vcmask 536024  }
 0x17d   :  { %v377_v5 = vmax.f32 %v373_v1, %v375_v56  ;;  %v410_v7 = vmax.f32 %v406_v62, %v5583_v25  ;;  %v444_v8 = vmax.f32 %v443_v4, %v420_v54  ;;  %v473_v27 = vsel %vm472_vm6, %v5589_v35, -inf  ;;  %v5623_v35 = vld [vmem:[%s6829_s10 + $0x20] sm:$0xff] }
 0x17e   :  { %vm508_vm6 = vcmask 105472   ;;  %v520_v4 = vld [vmem:[%s6830_s4] sm:$0xff] }
 0x17f   :  { %v414_v12 = vmax.f32 %v410_v7, %v5585_v26  ;;  %v446_v15 = vsel %vm445_vm12, %v444_v8, -inf  ;;  %v450_v18 = vsel %vm449_vm13, %v444_v8, -inf  ;;  %v454_v19 = vsel %vm453_vm14, %v444_v8, -inf  ;;  %v522_v7 = vld [vmem:[%s6830_s4 + $0x10] sm:$0xff]  ;;  %v523_v8 = vld [vmem:[%s6830_s4 + $0x18] sm:$0xff] }
 0x180   :  { %v347_v59 = vpop.permute.xlu1 %346  ;;  %339 = vmax.xlane.f32.xlu0 %v338_v57  ;;  %v379_v2 = vpop.permute.xlu0 %378  ;;  %vm490_vm12 = vcmask 31744   ;;  %vm492_vm13 = vcmask 39936   ;;  %vm494_vm14 = vcmask 48128  }
 0x181   :  { %v349_v61 = vsel %vm348_vm8, %v326_v45, %v347_v59  ;;  %v381_v9 = vmax.f32 %v377_v5, %v379_v2  ;;  %v418_v16 = vmax.f32 %v414_v12, %v5593_v43  ;;  %vm484_vm8 = vcmask 7168   ;;  %v5683_v12 = vld [vmem:[%s6829_s10 + $0x50] sm:$0xff] }
 0x182   :  { %v351_v63 = vmax.f32 %v324_v47, %v349_v61 }
 0x183   :  { %v383_v13 = vmax.f32 %v381_v9, %v347_v59  ;;  %v422_v20 = vmax.f32 %v418_v16, %v420_v54  ;;  %v524_v9 = vld [vmem:[%s6830_s4 + $0x20] sm:$0xf]  ;;  %v5697_v16 = vld [vmem:[%s6829_s10 + $0x10] sm:$0x3] }
 0x184   :  { %v353_v3 = vpop.permute.xlu1 %352 }
 0x185   :  { %v355_v6 = vmax.f32 %v351_v63, %v353_v3  ;;  %v384_v17 = vmax.f32 %v383_v13, %v353_v3  ;;  %v424_v23 = vsel %vm423_vm2, %v422_v20, -inf  ;;  %v432_v25 = vsel %vm431_vm4, %v422_v20, -inf  ;;  %v5690_v13 = vld [vmem:[%s6829_s10 + $0x48] sm:$0xff] }
 0x186   :  { %v428_v26 = vsel %vm427_vm5, %v422_v20, -inf  ;;  %vm500_vm2 = vcmask 72704   ;;  %vm504_vm4 = vcmask 89088   ;;  %vm506_vm5 = vcmask 97280   ;;  %v5713_v20 = vld [vmem:[%s6829_s10] sm:$0xff] }
 0x187   :  { %v361_v10 = vsel %vm360_vm9, %v355_v6, -inf  ;;  %v357_v11 = vsel %vm356_vm10, %v355_v6, -inf  ;;  %v365_v14 = vsel %vm364_vm11, %v355_v6, -inf  ;;  %v390_v21 = vsel %vm389_vm15, %v384_v17, -inf  ;;  %v521_v6 = vld [vmem:[%s6830_s4 + $0x8] sm:$0xff] }
 0x188   :  { %362 = vmax.xlane.f32.xlu1 %v361_v10  ;;  %358 = vmax.xlane.f32.xlu0 %v357_v11  ;;  %v386_v22 = vsel %vm385_vm1, %v384_v17, -inf  ;;  %v394_v24 = vsel %vm393_vm3, %v384_v17, -inf  ;;  %vm646_vm9 = vcmask 1041408   ;;  %vm486_vm10 = vcmask 15360   ;;  %v5668_v10 = vld [vmem:[%s6829_s10 + $0x18] sm:$0xff] }
 0x189   :  { %4903 = vmatpush3.msk.msra.mxu1 %vm646_vm9, %v5618_v34  ;;  %vm488_vm11 = vcmask 23552   ;;  %vm496_vm15 = vcmask 56320   ;;  %vm498_vm1 = vcmask 64512   ;;  %vm502_vm3 = vcmask 80896   ;;  %v5674_v11 = vld [vmem:[%s6829_s10 + $0x58] sm:$0x3] }
 0x18a   :  { %4904 = vmatprep.subr.mxu1 %v5268_v30 }
 0x18b   :  { %4905 = vmatpush3.msra.mxu1 %v5623_v35 }
 0x18c   :  { %366 = vmax.xlane.f32.xlu0 %v365_v14  ;;  %447 = vmax.xlane.f32.xlu1 %v446_v15 }
 0x18d   :  { %4906 = vmatprep.subr.mxu1 %v5268_v30 }
 0x18e   :  { %4907 = vmatpush3.msra.mxu1 %v5668_v10 }
 0x18f   :  { %4911 = vmatprep.subr.mxu1 %v5268_v30 }
 0x190   :  { %451 = vmax.xlane.f32.xlu0 %v450_v18  ;;  %455 = vmax.xlane.f32.xlu1 %v454_v19  ;;  %v5703_v18 = vld [vmem:[%s6829_s10 + $0x8] sm:$0xff] }
 0x194   :  { %391 = vmax.xlane.f32.xlu0 %v390_v21  ;;  %387 = vmax.xlane.f32.xlu1 %v386_v22  ;;  %v5718_v22 = vld [vmem:[%s6829_s10 + $0x88] sm:$0x3] }
 0x198   :  { %425 = vmax.xlane.f32.xlu0 %v424_v23  ;;  %395 = vmax.xlane.f32.xlu1 %v394_v24  ;;  %v5725_v24 = vld [vmem:[%s6829_s10 + $0x40] sm:$0x3] }
 0x19c   :  { %433 = vmax.xlane.f32.xlu0 %v432_v25  ;;  %429 = vmax.xlane.f32.xlu1 %v428_v26  ;;  %v5736_v26 = vld [vmem:[%s6829_s10 + $0x38] sm:$0xff] }
 0x1a0   :  { %474 = vmax.xlane.f32.xlu0 %v473_v27  ;;  %v5741_v27 = vld [vmem:[%s6829_s10 + $0x80] sm:$0xff] }
 0x1b6   :  { %1365 = vperm.xlu0 %5194, %v1362_v28  }
 0x1ba   :  { %4371 = vperm.xlu0 %5194, %v4367_v29   ;;  %v5751_v29 = vld [vmem:[%s6829_s10 + $0x30] sm:$0xff] }
 0x1f6   :  { %v483_v31 = vpop.xlane.xlu1 %482  ;;  %v479_v32 = vpop.xlane.xlu0 %478 }
 0x1f7   :  { %v514_v33 = vsel %vm484_vm8, %v479_v32, %v483_v31  ;;  %v5757_v31 = vld [vmem:[%s6829_s10 + $0x78] sm:$0xff] }
 0x1f8   :  { %516 = vrot.lane.b32.xlu1 %v514_v33, %s5270_s5  ;;  %v5765_v33 = vld [vmem:[%s6829_s10 + $0x70] sm:$0x3] }
 0x205   :  { %v336_v36 = vpop.xlane.xlu0 %335  ;;  %v344_v37 = vpop.xlane.xlu1 %343 }
 0x209   :  { %v340_v38 = vpop.xlane.xlu0 %339 }
 0x20a   :  { %v485_v45 = vsel %vm484_vm8, %v336_v36, %v340_v38  ;;  %vm510_vm8 = vcmask 113664   ;;  %v5775_v38 = vld [vmem:[%s6829_s10 + $0x68] sm:$0xff] }
 0x20b   :  { %v487_v47 = vsel %vm486_vm10, %v485_v45, %v344_v37  ;;  %vm512_vm10 = vcmask 121856   ;;  %v5816_v45 = vld [vmem:[%s6829_s10 + $0x98] sm:$0xff] }
 0x211   :  { %v363_v39 = vpop.xlane.xlu1 %362  ;;  %v359_v40 = vpop.xlane.xlu0 %358 }
 0x212   :  { %v489_v48 = vsel %vm488_vm11, %v487_v47, %v359_v40  ;;  %vm540_vm11 = vcmask 1043456   ;;  %v5785_v40 = vld [vmem:[%s6829_s10 + $0x60] sm:$0xff]  ;;  %v5831_v47 = vld [vmem:[%s6829_s10 + $0xa8] sm:$0xff] }
 0x213   :  { %v491_v50 = vsel %vm490_vm12, %v489_v48, %v363_v39 }
 0x215   :  { %v448_v41 = vpop.xlane.xlu1 %447  ;;  %v367_v42 = vpop.xlane.xlu0 %366 }
 0x216   :  { %v493_v51 = vsel %vm492_vm13, %v491_v50, %v367_v42  ;;  %vm643_vm13 = vcmask 146432   ;;  %v5853_v50 = vld [vmem:[%s6829_s10 + $0xc8] sm:$0xff] }
 0x219   :  { %v456_v43 = vpop.xlane.xlu1 %455  ;;  %v452_v44 = vpop.xlane.xlu0 %451 }
 0x21d   :  { %v388_v46 = vpop.xlane.xlu1 %387  ;;  %v392_v49 = vpop.xlane.xlu0 %391 }
 0x21e   :  { %v495_v53 = vsel %vm494_vm14, %v493_v51, %v388_v46  ;;  %v5826_v46 = vld [vmem:[%s6829_s10 + $0x90] sm:$0xff]  ;;  %v5863_v51 = vld [vmem:[%s6829_s10 + $0xc0] sm:$0xff] }
 0x21f   :  { %v497_v55 = vsel %vm496_vm15, %v495_v53, %v392_v49  ;;  %v5843_v49 = vld [vmem:[%s6829_s10 + $0xd0] sm:$0x3] }
 0x221   :  { %v396_v52 = vpop.xlane.xlu1 %395  ;;  %v426_v54 = vpop.xlane.xlu0 %425 }
 0x222   :  { %v499_v56 = vsel %vm498_vm1, %v497_v55, %v396_v52 }
 0x223   :  { %v501_v58 = vsel %vm500_vm2, %v499_v56, %v426_v54 }
 0x225   :  { %v430_v57 = vpop.xlane.xlu1 %429  ;;  %v434_v60 = vpop.xlane.xlu0 %433 }
 0x226   :  { %v503_v59 = vsel %vm502_vm3, %v501_v58, %v430_v57 }
 0x227   :  { %v505_v61 = vsel %vm504_vm4, %v503_v59, %v434_v60 }
 0x228   :  { %v507_v62 = vsel %vm506_vm5, %v505_v61, %v448_v41  ;;  %v5792_v41 = vld [vmem:[%s6829_s10 + $0xb8] sm:$0x3] }
 0x229   :  { %v509_v63 = vsel %vm508_vm6, %v507_v62, %v452_v44  ;;  %v475_v1 = vpop.xlane.xlu0 %474  ;;  %v5809_v44 = vld [vmem:[%s6829_s10 + $0xb0] sm:$0xff] }
 0x22a   :  { %v511_v0 = vsel %vm510_vm8, %v509_v63, %v456_v43  ;;  %v5800_v43 = vld [vmem:[%s6829_s10 + $0xa0] sm:$0x3] }
 0x22b   :  { %v513_v2 = vsel %vm512_vm10, %v511_v0, %v475_v1 }
 0x26a   :  { %v517_v3 = vpop.permute.xlu1 %516 }
 0x26b   :  { %v519_v5 = vsel %vm163_vm0, %v513_v2, %v517_v3 }
 0x26c   :  { %4886 = vmatpush3.msk.msra.mxu0 %vm540_vm11, %v519_v5 }
 0x26d   :  { %4888 = vmatmul.mubr.msk.f32.vlgmr.msra.gmra.mxu0 %vm490_vm12, %v520_v4  ;;  %4929 = vmatprep.subr.mxu0 %v5268_v30 }
 0x26e   :  { %4890 = vmatprep.mubr.msk.f32.mxu0 %vm5269_vm7, %v5268_v30  ;;  %4930 = vmatpush3.msk.msra.mxu0 %vm646_vm9, %v5674_v11 }
 0x26f   :  { %4931 = vmatprep.subr.mxu0 %v5268_v30 }
 0x270   :  { %4932 = vmatpush3.msra.mxu0 %v5683_v12 }
 0x271   :  { %4891 = vmatmul.mubr.msk.f32.gmra.mxu0 %vm490_vm12, %v521_v6  ;;  %4933 = vmatprep.subr.mxu0 %v5268_v30 }
 0x272   :  { %4893 = vmatprep.mubr.msk.f32.mxu0 %vm5269_vm7, %v5268_v30  ;;  %4934 = vmatpush3.msra.mxu0 %v5690_v13 }
 0x273   :  { %4947 = vmatprep.subr.mxu0 %v5268_v30 }
 0x275   :  { %4894 = vmatmul.mubr.msk.f32.gmra.mxu0 %vm490_vm12, %v522_v7 }
 0x276   :  { %4896 = vmatprep.mubr.msk.f32.mxu0 %vm5269_vm7, %v5268_v30 }
 0x279   :  { %4897 = vmatmul.mubr.msk.f32.gmra.mxu0 %vm490_vm12, %v523_v8 }
 0x27a   :  { %4899 = vmatprep.mubr.msk.f32.mxu0 %vm5269_vm7, %v5268_v30 }
 0x27d   :  { %4900 = vmatmul.mubr.msk.f32.gmra.mxu0 %vm490_vm12, %v524_v9 }
 0x27e   :  { %4935 = vmatprep.mubr.msk.f32.mxu0 %vm5269_vm7, %v5268_v30 }
 0x32d   :  { %v610_v14 = vpop.f32.mrf.mxu0 }
 0x32e   :  { %v642_v15 = vrot.slane %v610_v14, 4 }
 0x32f   :  { %v4889_v17 = vpop.f32.mrf.mxu0 }
 0x330   :  { %4909 = vmatmul.mubr.msk.f32.vlgmr.msra.gmra.mxu1 %vm643_vm13, %v642_v15 }
 0x331   :  { %4912 = vmatpush3.msk.msra.mxu1 %vm646_vm9, %v5697_v16  ;;  %4917 = vmatprep.mubr.msk.f32.mxu1 %vm5269_vm7, %v5268_v30  ;;  %v615_v19 = vpop.f32.mrf.mxu0 }
 0x332   :  { %4913 = vmatprep.subr.mxu1 %v5268_v30  ;;  %v880_v21 = vrot.slane %v615_v19, 4 }
 0x333   :  { %4914 = vmatpush3.msra.mxu1 %v5703_v18  ;;  %v4892_v23 = vpop.f32.mrf.mxu0 }
 0x334   :  { %4915 = vmatprep.subr.mxu1 %v5268_v30  ;;  %4936 = vmatmul.mubr.msk.f32.vlgmr.msra.gmra.mxu0 %vm643_vm13, %v880_v21 }
 0x335   :  { %4916 = vmatpush3.msra.mxu1 %v5713_v20  ;;  %4948 = vmatpush3.msk.msra.mxu0 %vm646_vm9, %v5718_v22  ;;  %v620_v25 = vpop.f32.mrf.mxu0 }
 0x336   :  { %4918 = vmatmul.mubr.msk.f32.vlgmr.msra.gmra.mxu1 %vm643_vm13, %v610_v14  ;;  %4920 = vmatprep.subr.mxu1 %v5268_v30  ;;  %v1042_v36 = vrot.slane %v620_v25, 4 }
 0x337   :  { %4921 = vmatpush3.msk.msra.mxu1 %vm646_vm9, %v5725_v24  ;;  %4926 = vmatprep.mubr.msk.f32.mxu1 %vm5269_vm7, %v5268_v30  ;;  %v4895_v28 = vpop.f32.mrf.mxu0 }
 0x338   :  { %4922 = vmatprep.subr.mxu1 %v5268_v30  ;;  %4949 = vmatprep.subr.mxu0 %v5268_v30  ;;  %v1370_v28 = vld [vmem:[%s6831_s6] sm:$0xff] }
 0x339   :  { %4923 = vmatpush3.msra.mxu1 %v5736_v26  ;;  %4950 = vmatpush3.msra.mxu0 %v5741_v27  ;;  %v625_v32 = vpop.f32.mrf.mxu0 }
 0x33a   :  { %4924 = vmatprep.subr.mxu1 %v5268_v30  ;;  %4951 = vmatprep.subr.mxu0 %v5268_v30  ;;  %v1204_v48 = vrot.slane %v625_v32, 4 }
 0x33b   :  { %4925 = vmatpush3.msra.mxu1 %v5751_v29  ;;  %4952 = vmatpush3.msra.mxu0 %v5757_v31  ;;  %v4898_v37 = vpop.f32.mrf.mxu0 }
 0x33c   :  { %4927 = vmatmul.mubr.msk.f32.vlgmr.msra.gmra.mxu1 %vm643_vm13, %v615_v19  ;;  %4938 = vmatprep.subr.mxu1 %v5268_v30  ;;  %v1366_v19 = vpop.permute.xlu0 %1365  ;;  %v1373_v37 = vld [vmem:[%s6831_s6 + $0x18] sm:$0xff] }
 0x33d   :  { %4939 = vmatpush3.msk.msra.mxu1 %vm646_vm9, %v5765_v33  ;;  %4944 = vmatprep.mubr.msk.f32.mxu1 %vm5269_vm7, %v5268_v30  ;;  %v630_v39 = vpop.f32.mrf.mxu0 }
 0x33e   :  { %4940 = vmatprep.subr.mxu1 %v5268_v30  ;;  %4953 = vmatprep.mubr.msk.f32.mxu0 %vm5269_vm7, %v5268_v30 }
 0x33f   :  { %4941 = vmatpush3.msra.mxu1 %v5775_v38  ;;  %4954 = vmatmul.mubr.msk.f32.vlgmr.msra.gmra.mxu0 %vm643_vm13, %v1042_v36  ;;  %v4901_v42 = vpop.f32.mrf.mxu0  ;;  %v1372_v36 = vld [vmem:[%s6831_s6 + $0x10] sm:$0xff] }
 0x340   :  { %4942 = vmatprep.subr.mxu1 %v5268_v30  ;;  %4965 = vmatprep.subr.mxu0 %v5268_v30  ;;  %v2147_v42 = vld [vmem:[%s6832_s7] sm:$0xf] }
 0x341   :  { %4943 = vmatpush3.msra.mxu1 %v5785_v40  ;;  %4966 = vmatpush3.msk.msra.mxu0 %vm646_vm9, %v5792_v41 }
 0x342   :  { %4945 = vmatmul.mubr.msk.f32.vlgmr.msra.gmra.mxu1 %vm643_vm13, %v620_v25  ;;  %4956 = vmatprep.subr.mxu1 %v5268_v30 }
 0x343   :  { %4957 = vmatpush3.msk.msra.mxu1 %vm646_vm9, %v5800_v43  ;;  %4967 = vmatprep.subr.mxu0 %v5268_v30 }
 0x344   :  { %4958 = vmatprep.subr.mxu1 %v5268_v30  ;;  %4968 = vmatpush3.msra.mxu0 %v5809_v44 }
 0x345   :  { %4959 = vmatpush3.msra.mxu1 %v5816_v45  ;;  %4962 = vmatprep.mubr.msk.f32.mxu1 %vm5269_vm7, %v5268_v30 }
 0x346   :  { %4960 = vmatprep.subr.mxu1 %v5268_v30  ;;  %4969 = vmatprep.subr.mxu0 %v5268_v30 }
 0x347   :  { %4961 = vmatpush3.msra.mxu1 %v5826_v46  ;;  %4970 = vmatpush3.msra.mxu0 %v5831_v47 }
 0x348   :  { %4963 = vmatmul.mubr.msk.f32.vlgmr.msra.gmra.mxu1 %vm643_vm13, %v625_v32  ;;  %4971 = vmatprep.mubr.msk.f32.mxu0 %vm5269_vm7, %v5268_v30  ;;  %v1371_v32 = vld [vmem:[%s6831_s6 + $0x8] sm:$0xff] }
 0x349   :  { %4974 = vmatprep.subr.mxu1 %v5268_v30  ;;  %4972 = vmatmul.mubr.msk.f32.vlgmr.msra.gmra.mxu0 %vm643_vm13, %v1204_v48  ;;  %v2932_v48 = vld [vmem:[%s6833_s9] sm:$0xf] }
 0x34a   :  { %4975 = vmatpush3.msk.msra.mxu1 %vm646_vm9, %v5843_v49  ;;  %4980 = vmatprep.mubr.msk.f32.mxu1 %vm5269_vm7, %v5268_v30 }
 0x34b   :  { %4976 = vmatprep.subr.mxu1 %v5268_v30  ;;  %4983 = vmatprep.subr.mxu0 %v5268_v30 }
 0x34c   :  { %4977 = vmatpush3.msra.mxu1 %v5853_v50  ;;  %4985 = vmatprep.mubr.msk.f32.mxu0 %vm5269_vm7, %v5268_v30 }
 0x34d   :  { %4978 = vmatprep.subr.mxu1 %v5268_v30  ;;  %2150 = vperm.xlu1 %5195, %v2147_v42  }
 0x34e   :  { %4979 = vmatpush3.msra.mxu1 %v5863_v51 }
 0x34f   :  { %4981 = vmatmul.mubr.msk.f32.vlgmr.msra.gmra.mxu1 %vm643_vm13, %v630_v39  ;;  %5000 = vmatprep.subr.mxu1 %v5268_v30  ;;  %v1374_v39 = vld [vmem:[%s6831_s6 + $0x20] sm:$0xf] }
 0x350   :  { %5001 = vmatpush3.msk.msra.mxu1 %vm646_vm9, %v5618_v34  ;;  %5006 = vmatprep.mubr.msk.f32.mxu1 %vm5269_vm7, %v5268_v30 }
 0x351   :  { %5002 = vmatprep.subr.mxu1 %v5268_v30  ;;  %2935 = vperm.xlu1 %5195, %v2932_v48  }
 0x352   :  { %5003 = vmatpush3.msra.mxu1 %v5623_v35 }
 0x353   :  { %5004 = vmatprep.subr.mxu1 %v5268_v30 }
 0x354   :  { %5005 = vmatpush3.msra.mxu1 %v5668_v10 }
 0x355   :  { %5009 = vmatprep.subr.mxu1 %v5268_v30 }
 0x3f0   :  { %v716_v52 = vpop.f32.mrf.mxu1 }
 0x3f2   :  { %v4910_v53 = vpop.f32.mrf.mxu1 }
 0x3f4   :  { %v952_v54 = vpop.f32.mrf.mxu0 }
 0x3f6   :  { %v791_v55 = vpop.f32.mrf.mxu1  ;;  %v4937_v56 = vpop.f32.mrf.mxu0 }
 0x3f7   :  { %v792_v58 = vadd.f32 %v791_v55, %v716_v52  ;;  %v4368_v52 = vld [vmem:[%s6828_s14 + $0x8] sm:$0xff] }
 0x3f8   :  { %v4919_v57 = vpop.f32.mrf.mxu1  ;;  %4376 = vperm.xlu1 %5195, %v4368_v52  }
 0x3fc   :  { %v871_v59 = vpop.f32.mrf.mxu1 }
 0x3fd   :  { %v875_v60 = vadd.f32 %v871_v59, %v792_v58 }
 0x3fe   :  { %v4928_v61 = vpop.f32.mrf.mxu1 }
 0x3ff   :  { %v1114_v62 = vpop.f32.mrf.mxu0  ;;  %v956_v0 = vadd.f32 %v952_v54, %v875_v60 }
 0x401   :  { %v4955_v63 = vpop.f32.mrf.mxu0 }
 0x402   :  { %v1033_v1 = vpop.f32.mrf.mxu1 }
 0x403   :  { %v1037_v2 = vadd.f32 %v1033_v1, %v956_v0 }
 0x404   :  { %v4946_v3 = vpop.f32.mrf.mxu1 }
 0x405   :  { %v1118_v4 = vadd.f32 %v1114_v62, %v1037_v2 }
 0x408   :  { %v1195_v5 = vpop.f32.mrf.mxu1 }
 0x409   :  { %v1276_v6 = vpop.f32.mrf.mxu0  ;;  %v1199_v7 = vadd.f32 %v1195_v5, %v1118_v4 }
 0x40a   :  { %v4964_v8 = vpop.f32.mrf.mxu1 }
 0x40b   :  { %v4973_v9 = vpop.f32.mrf.mxu0  ;;  %v1280_v14 = vadd.f32 %v1276_v6, %v1199_v7 }
 0x40f   :  { %v1357_v15 = vpop.f32.mrf.mxu1 }
 0x410   :  { %v1361_v17 = vadd.f32 %v1357_v15, %v1280_v14 }
 0x411   :  { %v4982_v21 = vpop.f32.mrf.mxu1 }
 0x412   :  { %v1368_v23 = vadd.f32 %v1366_v19, %v1361_v17 }
 0x414   :  { %v1369_v25 = vmax.f32 %v1368_v23, 0.0 }
 0x416   :  { %4984 = vmatpush3.msk.msra.mxu0 %vm540_vm11, %v1369_v25 }
 0x417   :  { %4986 = vmatmul.mubr.msk.f32.vlgmr.msra.gmra.mxu0 %vm490_vm12, %v1370_v28  ;;  %5027 = vmatprep.subr.mxu0 %v5268_v30 }
 0x418   :  { %4988 = vmatprep.mubr.msk.f32.mxu0 %vm5269_vm7, %v5268_v30  ;;  %5028 = vmatpush3.msk.msra.mxu0 %vm646_vm9, %v5674_v11 }
 0x419   :  { %5029 = vmatprep.subr.mxu0 %v5268_v30 }
 0x41a   :  { %5030 = vmatpush3.msra.mxu0 %v5683_v12 }
 0x41b   :  { %4989 = vmatmul.mubr.msk.f32.gmra.mxu0 %vm490_vm12, %v1371_v32  ;;  %5031 = vmatprep.subr.mxu0 %v5268_v30 }
 0x41c   :  { %4991 = vmatprep.mubr.msk.f32.mxu0 %vm5269_vm7, %v5268_v30  ;;  %5032 = vmatpush3.msra.mxu0 %v5690_v13 }
 0x41d   :  { %5045 = vmatprep.subr.mxu0 %v5268_v30 }
 0x41f   :  { %4992 = vmatmul.mubr.msk.f32.gmra.mxu0 %vm490_vm12, %v1372_v36 }
 0x420   :  { %4994 = vmatprep.mubr.msk.f32.mxu0 %vm5269_vm7, %v5268_v30 }
 0x423   :  { %4995 = vmatmul.mubr.msk.f32.gmra.mxu0 %vm490_vm12, %v1373_v37 }
 0x424   :  { %4997 = vmatprep.mubr.msk.f32.mxu0 %vm5269_vm7, %v5268_v30 }
 0x427   :  { %4998 = vmatmul.mubr.msk.f32.gmra.mxu0 %vm490_vm12, %v1374_v39 }
 0x428   :  { %5033 = vmatprep.mubr.msk.f32.mxu0 %vm5269_vm7, %v5268_v30 }
 0x4d7   :  { %v1459_v53 = vpop.f32.mrf.mxu0 }
 0x4d8   :  { %v1484_v54 = vrot.slane %v1459_v53, 4 }
 0x4d9   :  { %v4987_v55 = vpop.f32.mrf.mxu0 }
 0x4da   :  { %5007 = vmatmul.mubr.msk.f32.vlgmr.msra.gmra.mxu1 %vm643_vm13, %v1484_v54 }
 0x4db   :  { %5010 = vmatpush3.msk.msra.mxu1 %vm646_vm9, %v5697_v16  ;;  %5015 = vmatprep.mubr.msk.f32.mxu1 %vm5269_vm7, %v5268_v30  ;;  %v1464_v56 = vpop.f32.mrf.mxu0 }
 0x4dc   :  { %5011 = vmatprep.subr.mxu1 %v5268_v30  ;;  %v1703_v57 = vrot.slane %v1464_v56, 4 }
 0x4dd   :  { %5012 = vmatpush3.msra.mxu1 %v5703_v18  ;;  %v4990_v58 = vpop.f32.mrf.mxu0 }
 0x4de   :  { %5013 = vmatprep.subr.mxu1 %v5268_v30  ;;  %5034 = vmatmul.mubr.msk.f32.vlgmr.msra.gmra.mxu0 %vm643_vm13, %v1703_v57  ;;  %v2155_v57 = vld [vmem:[%s6834_s8] sm:$0xff]  ;;  %v2156_v58 = vld [vmem:[%s6834_s8 + $0x8] sm:$0xff] }
 0x4df   :  { %5014 = vmatpush3.msra.mxu1 %v5713_v20  ;;  %5046 = vmatpush3.msk.msra.mxu0 %vm646_vm9, %v5718_v22  ;;  %v1469_v59 = vpop.f32.mrf.mxu0 }
 0x4e0   :  { %5016 = vmatmul.mubr.msk.f32.vlgmr.msra.gmra.mxu1 %vm643_vm13, %v1459_v53  ;;  %5018 = vmatprep.subr.mxu1 %v5268_v30  ;;  %v1851_v62 = vrot.slane %v1469_v59, 4  ;;  %v2151_v53 = vpop.permute.xlu1 %2150 }
 0x4e1   :  { %5019 = vmatpush3.msk.msra.mxu1 %vm646_vm9, %v5725_v24  ;;  %5024 = vmatprep.mubr.msk.f32.mxu1 %vm5269_vm7, %v5268_v30  ;;  %v4993_v60 = vpop.f32.mrf.mxu0 }
 0x4e2   :  { %5020 = vmatprep.subr.mxu1 %v5268_v30  ;;  %5047 = vmatprep.subr.mxu0 %v5268_v30 }
 0x4e3   :  { %5021 = vmatpush3.msra.mxu1 %v5736_v26  ;;  %5048 = vmatpush3.msra.mxu0 %v5741_v27  ;;  %v1474_v61 = vpop.f32.mrf.mxu0 }
 0x4e4   :  { %5022 = vmatprep.subr.mxu1 %v5268_v30  ;;  %5049 = vmatprep.subr.mxu0 %v5268_v30  ;;  %v1999_v2 = vrot.slane %v1474_v61, 4 }
 0x4e5   :  { %5023 = vmatpush3.msra.mxu1 %v5751_v29  ;;  %5050 = vmatpush3.msra.mxu0 %v5757_v31  ;;  %v4996_v63 = vpop.f32.mrf.mxu0 }
 0x4e6   :  { %5025 = vmatmul.mubr.msk.f32.vlgmr.msra.gmra.mxu1 %vm643_vm13, %v1464_v56  ;;  %5036 = vmatprep.subr.mxu1 %v5268_v30 }
 0x4e7   :  { %5037 = vmatpush3.msk.msra.mxu1 %vm646_vm9, %v5765_v33  ;;  %5042 = vmatprep.mubr.msk.f32.mxu1 %vm5269_vm7, %v5268_v30  ;;  %v1479_v0 = vpop.f32.mrf.mxu0 }
 0x4e8   :  { %5038 = vmatprep.subr.mxu1 %v5268_v30  ;;  %5051 = vmatprep.mubr.msk.f32.mxu0 %vm5269_vm7, %v5268_v30 }
 0x4e9   :  { %5039 = vmatpush3.msra.mxu1 %v5775_v38  ;;  %5052 = vmatmul.mubr.msk.f32.vlgmr.msra.gmra.mxu0 %vm643_vm13, %v1851_v62  ;;  %v4999_v1 = vpop.f32.mrf.mxu0 }
 0x4ea   :  { %5040 = vmatprep.subr.mxu1 %v5268_v30  ;;  %5063 = vmatprep.subr.mxu0 %v5268_v30 }
 0x4eb   :  { %5041 = vmatpush3.msra.mxu1 %v5785_v40  ;;  %5064 = vmatpush3.msk.msra.mxu0 %vm646_vm9, %v5792_v41 }
 0x4ec   :  { %5043 = vmatmul.mubr.msk.f32.vlgmr.msra.gmra.mxu1 %vm643_vm13, %v1469_v59  ;;  %5054 = vmatprep.subr.mxu1 %v5268_v30  ;;  %v2157_v59 = vld [vmem:[%s6834_s8 + $0x10] sm:$0xff] }
 0x4ed   :  { %5055 = vmatpush3.msk.msra.mxu1 %vm646_vm9, %v5800_v43  ;;  %5065 = vmatprep.subr.mxu0 %v5268_v30 }
 0x4ee   :  { %5056 = vmatprep.subr.mxu1 %v5268_v30  ;;  %5066 = vmatpush3.msra.mxu0 %v5809_v44 }
 0x4ef   :  { %5057 = vmatpush3.msra.mxu1 %v5816_v45  ;;  %5060 = vmatprep.mubr.msk.f32.mxu1 %vm5269_vm7, %v5268_v30 }
 0x4f0   :  { %5058 = vmatprep.subr.mxu1 %v5268_v30  ;;  %5067 = vmatprep.subr.mxu0 %v5268_v30 }
 0x4f1   :  { %5059 = vmatpush3.msra.mxu1 %v5826_v46  ;;  %5068 = vmatpush3.msra.mxu0 %v5831_v47 }
 0x4f2   :  { %5061 = vmatmul.mubr.msk.f32.vlgmr.msra.gmra.mxu1 %vm643_vm13, %v1474_v61  ;;  %5069 = vmatprep.mubr.msk.f32.mxu0 %vm5269_vm7, %v5268_v30 }
 0x4f3   :  { %5072 = vmatprep.subr.mxu1 %v5268_v30  ;;  %5070 = vmatmul.mubr.msk.f32.vlgmr.msra.gmra.mxu0 %vm643_vm13, %v1999_v2 }
 0x4f4   :  { %5073 = vmatpush3.msk.msra.mxu1 %vm646_vm9, %v5843_v49  ;;  %5078 = vmatprep.mubr.msk.f32.mxu1 %vm5269_vm7, %v5268_v30 }
 0x4f5   :  { %5074 = vmatprep.subr.mxu1 %v5268_v30  ;;  %5081 = vmatprep.subr.mxu0 %v5268_v30 }
 0x4f6   :  { %5075 = vmatpush3.msra.mxu1 %v5853_v50  ;;  %5083 = vmatprep.mubr.msk.f32.mxu0 %vm5269_vm7, %v5268_v30 }
 0x4f7   :  { %5076 = vmatprep.subr.mxu1 %v5268_v30 }
 0x4f8   :  { %5077 = vmatpush3.msra.mxu1 %v5863_v51 }
 0x4f9   :  { %5079 = vmatmul.mubr.msk.f32.vlgmr.msra.gmra.mxu1 %vm643_vm13, %v1479_v0  ;;  %5098 = vmatprep.subr.mxu1 %v5268_v30 }
 0x4fa   :  { %5099 = vmatpush3.msk.msra.mxu1 %vm646_vm9, %v5618_v34  ;;  %5104 = vmatprep.mubr.msk.f32.mxu1 %vm5269_vm7, %v5268_v30 }
 0x4fb   :  { %5100 = vmatprep.subr.mxu1 %v5268_v30 }
 0x4fc   :  { %5101 = vmatpush3.msra.mxu1 %v5623_v35 }
 0x4fd   :  { %5102 = vmatprep.subr.mxu1 %v5268_v30 }
 0x4fe   :  { %5103 = vmatpush3.msra.mxu1 %v5668_v10 }
 0x4ff   :  { %5107 = vmatprep.subr.mxu1 %v5268_v30 }
 0x59a   :  { %v1553_v3 = vpop.f32.mrf.mxu1 }
 0x59c   :  { %v5008_v4 = vpop.f32.mrf.mxu1 }
 0x59e   :  { %v1772_v5 = vpop.f32.mrf.mxu0 }
 0x5a0   :  { %v1625_v6 = vpop.f32.mrf.mxu1  ;;  %v5035_v7 = vpop.f32.mrf.mxu0 }
 0x5a1   :  { %v1626_v34 = vadd.f32 %v1625_v6, %v1553_v3 }
 0x5a2   :  { %v5017_v8 = vpop.f32.mrf.mxu1 }
 0x5a6   :  { %v1698_v9 = vpop.f32.mrf.mxu1 }
 0x5a7   :  { %v1702_v14 = vadd.f32 %v1698_v9, %v1626_v34 }
 0x5a8   :  { %v5026_v15 = vpop.f32.mrf.mxu1 }
 0x5a9   :  { %v1920_v17 = vpop.f32.mrf.mxu0  ;;  %v1776_v21 = vadd.f32 %v1772_v5, %v1702_v14 }
 0x5ab   :  { %v5053_v19 = vpop.f32.mrf.mxu0 }
 0x5ac   :  { %v1846_v35 = vpop.f32.mrf.mxu1 }
 0x5ad   :  { %v1850_v23 = vadd.f32 %v1846_v35, %v1776_v21 }
 0x5ae   :  { %v5044_v25 = vpop.f32.mrf.mxu1 }
 0x5af   :  { %v1924_v28 = vadd.f32 %v1920_v17, %v1850_v23  ;;  %v2936_v23 = vpop.permute.xlu1 %2935 }
 0x5b2   :  { %v1994_v10 = vpop.f32.mrf.mxu1 }
 0x5b3   :  { %v2068_v32 = vpop.f32.mrf.mxu0  ;;  %v1998_v36 = vadd.f32 %v1994_v10, %v1924_v28  ;;  %v2940_v10 = vld [vmem:[%s6835_s13 + $0x8] sm:$0xff] }
 0x5b4   :  { %v5062_v37 = vpop.f32.mrf.mxu1 }
 0x5b5   :  { %v5071_v39 = vpop.f32.mrf.mxu0  ;;  %v2072_v42 = vadd.f32 %v2068_v32, %v1998_v36  ;;  %v3062_v32 = vld [vmem:[%s6836_s11 + $0x118] sm:$0x3]  ;;  %v3061_v36 = vld [vmem:[%s6836_s11 + $0x110] sm:$0x3] }
 0x5b6   :  { %v3046_v37 = vld [vmem:[%s6836_s11 + $0x98] sm:$0xff]  ;;  %v3043_v39 = vld [vmem:[%s6836_s11 + $0x80] sm:$0xff] }
 0x5b9   :  { %v2142_v48 = vpop.f32.mrf.mxu1 }
 0x5ba   :  { %v2146_v52 = vadd.f32 %v2142_v48, %v2072_v42  ;;  %v3045_v42 = vld [vmem:[%s6836_s11 + $0x90] sm:$0xff]  ;;  %v3028_v48 = vld [vmem:[%s6836_s11 + $0x8] sm:$0xff] }
 0x5bb   :  { %v5080_v54 = vpop.f32.mrf.mxu1 }
 0x5bc   :  { %v2153_v55 = vadd.f32 %v2151_v53, %v2146_v52  ;;  %v3030_v52 = vld [vmem:[%s6836_s11 + $0x18] sm:$0xff]  ;;  %v3027_v53 = vld [vmem:[%s6836_s11] sm:$0xff]  ;;  %v3029_v54 = vld [vmem:[%s6836_s11 + $0x10] sm:$0xff] }
 0x5be   :  { %v2154_v56 = vmax.f32 %v2153_v55, 0.0  ;;  %v3064_v55 = vld [vmem:[%s6836_s11 + $0x128] sm:$0x3] }
 0x5c0   :  { %5082 = vmatpush3.msk.msra.mxu0 %vm540_vm11, %v2154_v56  ;;  %v3066_v56 = vld [vmem:[%s6836_s11 + $0x138] sm:$0x3] }
 0x5c1   :  { %5084 = vmatmul.mubr.msk.f32.vlgmr.msra.gmra.mxu0 %vm490_vm12, %v2155_v57  ;;  %5125 = vmatprep.subr.mxu0 %v5268_v30 }
 0x5c2   :  { %5086 = vmatprep.mubr.msk.f32.mxu0 %vm5269_vm7, %v5268_v30  ;;  %5126 = vmatpush3.msk.msra.mxu0 %vm646_vm9, %v5674_v11  ;;  %v2158_v11 = vld [vmem:[%s6834_s8 + $0x18] sm:$0xff] }
 0x5c3   :  { %5127 = vmatprep.subr.mxu0 %v5268_v30 }
 0x5c4   :  { %5128 = vmatpush3.msra.mxu0 %v5683_v12  ;;  %v2159_v12 = vld [vmem:[%s6834_s8 + $0x20] sm:$0xf] }
 0x5c5   :  { %5087 = vmatmul.mubr.msk.f32.gmra.mxu0 %vm490_vm12, %v2156_v58  ;;  %5129 = vmatprep.subr.mxu0 %v5268_v30 }
 0x5c6   :  { %5089 = vmatprep.mubr.msk.f32.mxu0 %vm5269_vm7, %v5268_v30  ;;  %5130 = vmatpush3.msra.mxu0 %v5690_v13 }
 0x5c7   :  { %5143 = vmatprep.subr.mxu0 %v5268_v30 }
 0x5c9   :  { %5090 = vmatmul.mubr.msk.f32.gmra.mxu0 %vm490_vm12, %v2157_v59  ;;  %v3063_v59 = vld [vmem:[%s6836_s11 + $0x120] sm:$0x3] }
 0x5ca   :  { %5092 = vmatprep.mubr.msk.f32.mxu0 %vm5269_vm7, %v5268_v30 }
 0x5cd   :  { %5093 = vmatmul.mubr.msk.f32.gmra.mxu0 %vm490_vm12, %v2158_v11  ;;  %v3065_v11 = vld [vmem:[%s6836_s11 + $0x130] sm:$0x3] }
 0x5ce   :  { %5095 = vmatprep.mubr.msk.f32.mxu0 %vm5269_vm7, %v5268_v30 }
 0x5d1   :  { %5096 = vmatmul.mubr.msk.f32.gmra.mxu0 %vm490_vm12, %v2159_v12  ;;  %v3048_v12 = vld [vmem:[%s6836_s11 + $0xa8] sm:$0xff] }
 0x5d2   :  { %5131 = vmatprep.mubr.msk.f32.mxu0 %vm5269_vm7, %v5268_v30 }
 0x681   :  { %v2244_v13 = vpop.f32.mrf.mxu0 }
 0x682   :  { %v2269_v60 = vrot.slane %v2244_v13, 4 }
 0x683   :  { %v5085_v61 = vpop.f32.mrf.mxu0 }
 0x684   :  { %5105 = vmatmul.mubr.msk.f32.vlgmr.msra.gmra.mxu1 %vm643_vm13, %v2269_v60  ;;  %v3047_v60 = vld [vmem:[%s6836_s11 + $0xa0] sm:$0xff]  ;;  %v3049_v61 = vld [vmem:[%s6836_s11 + $0xb0] sm:$0xff] }
 0x685   :  { %5108 = vmatpush3.msk.msra.mxu1 %vm646_vm9, %v5697_v16  ;;  %5113 = vmatprep.mubr.msk.f32.mxu1 %vm5269_vm7, %v5268_v30  ;;  %v2249_v62 = vpop.f32.mrf.mxu0 }
 0x686   :  { %5109 = vmatprep.subr.mxu1 %v5268_v30  ;;  %v2488_v63 = vrot.slane %v2249_v62, 4 }
 0x687   :  { %5110 = vmatpush3.msra.mxu1 %v5703_v18  ;;  %v5088_v0 = vpop.f32.mrf.mxu0 }
 0x688   :  { %5111 = vmatprep.subr.mxu1 %v5268_v30  ;;  %5132 = vmatmul.mubr.msk.f32.vlgmr.msra.gmra.mxu0 %vm643_vm13, %v2488_v63  ;;  %v3034_v63 = vld [vmem:[%s6836_s11 + $0x38] sm:$0xff]  ;;  %v3031_v0 = vld [vmem:[%s6836_s11 + $0x20] sm:$0xff] }
 0x689   :  { %5112 = vmatpush3.msra.mxu1 %v5713_v20  ;;  %5144 = vmatpush3.msk.msra.mxu0 %vm646_vm9, %v5718_v22  ;;  %v2254_v16 = vpop.f32.mrf.mxu0 }
 0x68a   :  { %5114 = vmatmul.mubr.msk.f32.vlgmr.msra.gmra.mxu1 %vm643_vm13, %v2244_v13  ;;  %5116 = vmatprep.subr.mxu1 %v5268_v30  ;;  %v2636_v22 = vrot.slane %v2254_v16, 4  ;;  %v3050_v13 = vld [vmem:[%s6836_s11 + $0xb8] sm:$0xff] }
 0x68b   :  { %5117 = vmatpush3.msk.msra.mxu1 %vm646_vm9, %v5725_v24  ;;  %5122 = vmatprep.mubr.msk.f32.mxu1 %vm5269_vm7, %v5268_v30  ;;  %v5091_v18 = vpop.f32.mrf.mxu0 }
 0x68c   :  { %5118 = vmatprep.subr.mxu1 %v5268_v30  ;;  %5145 = vmatprep.subr.mxu0 %v5268_v30  ;;  %v3068_v18 = vld [vmem:[%s6836_s11 + $0x148] sm:$0x3] }
 0x68d   :  { %5119 = vmatpush3.msra.mxu1 %v5736_v26  ;;  %5146 = vmatpush3.msra.mxu0 %v5741_v27  ;;  %v2259_v20 = vpop.f32.mrf.mxu0 }
 0x68e   :  { %5120 = vmatprep.subr.mxu1 %v5268_v30  ;;  %5147 = vmatprep.subr.mxu0 %v5268_v30 }
 0x68f   :  { %5121 = vmatpush3.msra.mxu1 %v5751_v29  ;;  %5148 = vmatpush3.msra.mxu0 %v5757_v31  ;;  %v5094_v24 = vpop.f32.mrf.mxu0  ;;  %v2784_v29 = vrot.slane %v2259_v20, 4  ;;  %v2939_v31 = vld [vmem:[%s6835_s13] sm:$0xff] }
 0x690   :  { %5123 = vmatmul.mubr.msk.f32.vlgmr.msra.gmra.mxu1 %vm643_vm13, %v2249_v62  ;;  %5134 = vmatprep.subr.mxu1 %v5268_v30  ;;  %v3032_v62 = vld [vmem:[%s6836_s11 + $0x28] sm:$0xff]  ;;  %v3069_v24 = vld [vmem:[%s6836_s11 + $0x150] sm:$0x3] }
 0x691   :  { %5135 = vmatpush3.msk.msra.mxu1 %vm646_vm9, %v5765_v33  ;;  %5140 = vmatprep.mubr.msk.f32.mxu1 %vm5269_vm7, %v5268_v30  ;;  %v2264_v26 = vpop.f32.mrf.mxu0  ;;  %v3060_v33 = vld [vmem:[%s6836_s11 + $0x108] sm:$0x3] }
 0x692   :  { %5136 = vmatprep.subr.mxu1 %v5268_v30  ;;  %5149 = vmatprep.mubr.msk.f32.mxu0 %vm5269_vm7, %v5268_v30 }
 0x693   :  { %5137 = vmatpush3.msra.mxu1 %v5775_v38  ;;  %5150 = vmatmul.mubr.msk.f32.vlgmr.msra.gmra.mxu0 %vm643_vm13, %v2636_v22  ;;  %v5097_v27 = vpop.f32.mrf.mxu0  ;;  %v3059_v38 = vld [vmem:[%s6836_s11 + $0x100] sm:$0x3] }
 0x694   :  { %5138 = vmatprep.subr.mxu1 %v5268_v30  ;;  %5161 = vmatprep.subr.mxu0 %v5268_v30  ;;  %v3067_v22 = vld [vmem:[%s6836_s11 + $0x140] sm:$0x3]  ;;  %v3054_v27 = vld [vmem:[%s6836_s11 + $0xd8] sm:$0xff] }
 0x695   :  { %5139 = vmatpush3.msra.mxu1 %v5785_v40  ;;  %5162 = vmatpush3.msk.msra.mxu0 %vm646_vm9, %v5792_v41  ;;  %v3044_v40 = vld [vmem:[%s6836_s11 + $0x88] sm:$0xff] }
 0x696   :  { %5141 = vmatmul.mubr.msk.f32.vlgmr.msra.gmra.mxu1 %vm643_vm13, %v2254_v16  ;;  %5152 = vmatprep.subr.mxu1 %v5268_v30  ;;  %v3033_v16 = vld [vmem:[%s6836_s11 + $0x30] sm:$0xff] }
 0x697   :  { %5153 = vmatpush3.msk.msra.mxu1 %vm646_vm9, %v5800_v43  ;;  %5163 = vmatprep.subr.mxu0 %v5268_v30 }
 0x698   :  { %5154 = vmatprep.subr.mxu1 %v5268_v30  ;;  %5164 = vmatpush3.msra.mxu0 %v5809_v44 }
 0x699   :  { %5155 = vmatpush3.msra.mxu1 %v5816_v45  ;;  %5158 = vmatprep.mubr.msk.f32.mxu1 %vm5269_vm7, %v5268_v30 }
 0x69a   :  { %5156 = vmatprep.subr.mxu1 %v5268_v30  ;;  %5165 = vmatprep.subr.mxu0 %v5268_v30 }
 0x69b   :  { %5157 = vmatpush3.msra.mxu1 %v5826_v46  ;;  %5166 = vmatpush3.msra.mxu0 %v5831_v47 }
 0x69c   :  { %5159 = vmatmul.mubr.msk.f32.vlgmr.msra.gmra.mxu1 %vm643_vm13, %v2259_v20  ;;  %5167 = vmatprep.mubr.msk.f32.mxu0 %vm5269_vm7, %v5268_v30  ;;  %v3070_v20 = vld [vmem:[%s6836_s11 + $0x158] sm:$0x3] }
 0x69d   :  { %5170 = vmatprep.subr.mxu1 %v5268_v30  ;;  %5168 = vmatmul.mubr.msk.f32.vlgmr.msra.gmra.mxu0 %vm643_vm13, %v2784_v29  ;;  %v3051_v29 = vld [vmem:[%s6836_s11 + $0xc0] sm:$0xff] }
 0x69e   :  { %5171 = vmatpush3.msk.msra.mxu1 %vm646_vm9, %v5843_v49  ;;  %5176 = vmatprep.mubr.msk.f32.mxu1 %vm5269_vm7, %v5268_v30 }
 0x69f   :  { %5172 = vmatprep.subr.mxu1 %v5268_v30  ;;  %5181 = vmatprep.mubr.msk.f32.mxu0 %vm490_vm12, %v2939_v31  ;;  %v3053_v31 = vld [vmem:[%s6836_s11 + $0xd0] sm:$0xff] }
 0x6a0   :  { %5173 = vmatpush3.msra.mxu1 %v5853_v50 }
 0x6a1   :  { %5174 = vmatprep.subr.mxu1 %v5268_v30 }
 0x6a2   :  { %5175 = vmatpush3.msra.mxu1 %v5863_v51 }
 0x6a3   :  { %5177 = vmatmul.mubr.msk.f32.vlgmr.msra.gmra.mxu1 %vm643_vm13, %v2264_v26  ;;  %4708 = vmatprep.subr.msk.mxu1 %vm646_vm9, %v3060_v33  ;;  %v3052_v26 = vld [vmem:[%s6836_s11 + $0xc8] sm:$0xff] }
 0x6a4   :  { %3193 = vmatprep.mubr.f32.mxu1 %v5268_v30  ;;  %4709 = vmatpush1.msk.msra.mxu1 %vm646_vm9, %v3059_v38  ;;  %v3036_v33 = vld [vmem:[%s6836_s11 + $0x48] sm:$0xff]  ;;  %v3038_v38 = vld [vmem:[%s6836_s11 + $0x58] sm:$0xff] }
 0x6a5   :  { %3157 = vmatprep.subr.mxu1 %v3044_v40  ;;  %v3035_v40 = vld [vmem:[%s6836_s11 + $0x40] sm:$0xff] }
 0x6a6   :  { %3158 = vmatpush1.msra.mxu1 %v3043_v39  ;;  %v6470_v39 = vld [vmem:[%s6837_s0 + $0xd8] sm:$0xff] }
 0x6a7   :  { %3159 = vmatprep.subr.mxu1 %v3028_v48  ;;  %6855 = vst [vmem:[#allocation3_spill] sm:$0xff] %v6470_v39  ;;  %v6486_v48 = vld [vmem:[%s6837_s0 + $0xd0] sm:$0xff] }
 0x6a8   :  { %3160 = vmatpush1.msra.mxu1 %v3027_v53  ;;  %6857 = vst [vmem:[#allocation5_spill] sm:$0xff] %v6486_v48  ;;  %v6500_v53 = vld [vmem:[%s6837_s0 + $0x58] sm:$0xff] }
 0x6a9   :  { %4716 = vmatprep.subr.msk.mxu1 %vm646_vm9, %v3064_v55  ;;  %6859 = vst [vmem:[#allocation7_spill] sm:$0xff] %v6500_v53  ;;  %v6516_v55 = vld [vmem:[%s6837_s0 + $0x50] sm:$0xff] }
 0x744   :  { %v2338_v41 = vpop.f32.mrf.mxu1 }
 0x746   :  { %v5106_v43 = vpop.f32.mrf.mxu1 }
 0x747   :  { %v3072_v43 = vld [vmem:[%s6836_s11 + $0x168] sm:$0x3] }
 0x748   :  { %v2557_v44 = vpop.f32.mrf.mxu0 }
 0x74a   :  { %v2410_v45 = vpop.f32.mrf.mxu1  ;;  %v5133_v46 = vpop.f32.mrf.mxu0 }
 0x74b   :  { %v2411_v49 = vadd.f32 %v2410_v45, %v2338_v41  ;;  %v3037_v41 = vld [vmem:[%s6836_s11 + $0x50] sm:$0xff]  ;;  %v3071_v45 = vld [vmem:[%s6836_s11 + $0x160] sm:$0x3] }
 0x74c   :  { %v5115_v47 = vpop.f32.mrf.mxu1  ;;  %v3073_v46 = vld [vmem:[%s6836_s11 + $0x170] sm:$0x3] }
 0x74d   :  { %v3056_v47 = vld [vmem:[%s6836_s11 + $0xe8] sm:$0xff] }
 0x750   :  { %v2483_v50 = vpop.f32.mrf.mxu1 }
 0x751   :  { %v2487_v51 = vadd.f32 %v2483_v50, %v2411_v49  ;;  %v3058_v49 = vld [vmem:[%s6836_s11 + $0xf8] sm:$0xff]  ;;  %v3055_v50 = vld [vmem:[%s6836_s11 + $0xe0] sm:$0xff] }
 0x752   :  { %v5124_v1 = vpop.f32.mrf.mxu1 }
 0x753   :  { %v2705_v2 = vpop.f32.mrf.mxu0  ;;  %v2561_v4 = vadd.f32 %v2557_v44, %v2487_v51  ;;  %v3074_v44 = vld [vmem:[%s6836_s11 + $0x178] sm:$0x3]  ;;  %v3057_v51 = vld [vmem:[%s6836_s11 + $0xf0] sm:$0xff]  ;;  %v3040_v1 = vld [vmem:[%s6836_s11 + $0x68] sm:$0xff] }
 0x755   :  { %v5151_v3 = vpop.f32.mrf.mxu0 }
 0x756   :  { %v2631_v5 = vpop.f32.mrf.mxu1  ;;  %v3039_v3 = vld [vmem:[%s6836_s11 + $0x60] sm:$0xff] }
 0x757   :  { %v2635_v6 = vadd.f32 %v2631_v5, %v2561_v4  ;;  %v3041_v4 = vld [vmem:[%s6836_s11 + $0x70] sm:$0xff]  ;;  %v6336_v5 = vld [vmem:[%s6837_s0 + $0x88] sm:$0xff] }
 0x758   :  { %v5142_v7 = vpop.f32.mrf.mxu1 }
 0x759   :  { %v2709_v8 = vadd.f32 %v2705_v2, %v2635_v6  ;;  %v3042_v2 = vld [vmem:[%s6836_s11 + $0x78] sm:$0xff]  ;;  %v6351_v7 = vld [vmem:[%s6837_s0 + $0x80] sm:$0xff] }
 0x75a   :  { %v6341_v6 = vld [vmem:[%s6837_s0 + $0x98] sm:$0xff] }
 0x75c   :  { %v2779_v34 = vpop.f32.mrf.mxu1 }
 0x75d   :  { %v2853_v9 = vpop.f32.mrf.mxu0  ;;  %v2783_v14 = vadd.f32 %v2779_v34, %v2709_v8  ;;  %v6356_v8 = vld [vmem:[%s6837_s0 + $0x90] sm:$0xff]  ;;  %v6365_v34 = vld [vmem:[%s6837_s0 + $0x8] sm:$0xff] }
 0x75e   :  { %v5160_v15 = vpop.f32.mrf.mxu1 }
 0x75f   :  { %v5169_v17 = vpop.f32.mrf.mxu0  ;;  %v2857_v19 = vadd.f32 %v2853_v9, %v2783_v14  ;;  %v6370_v9 = vld [vmem:[%s6837_s0 + $0x18] sm:$0xff]  ;;  %v6377_v14 = vld [vmem:[%s6837_s0] sm:$0xff]  ;;  %v6386_v15 = vld [vmem:[%s6837_s0 + $0x10] sm:$0xff] }
 0x760   :  { %v6393_v17 = vld [vmem:[%s6838_s12] sm:$0xff] }
 0x763   :  { %v2927_v21 = vpop.f32.mrf.mxu1 }
 0x764   :  { %v2931_v35 = vadd.f32 %v2927_v21, %v2857_v19  ;;  %v6400_v19 = vld [vmem:[%s6837_s0 + $0xa8] sm:$0xff]  ;;  %v6405_v21 = vld [vmem:[%s6837_s0 + $0xb8] sm:$0xff] }
 0x765   :  { %v5178_v25 = vpop.f32.mrf.mxu1 }
 0x766   :  { %v2938_v28 = vadd.f32 %v2936_v23, %v2931_v35  ;;  %v6416_v35 = vld [vmem:[%s6837_s0 + $0xa0] sm:$0xff]  ;;  %v6421_v23 = vld [vmem:[%s6837_s0 + $0xb0] sm:$0xff]  ;;  %v6428_v25 = vld [vmem:[%s6838_s12 + $0x8] sm:$0xff] }
 0x768   :  { %5179 = vmatprep.subr.msk.mxu0 %vm540_vm11, %v2938_v28 }
 0x769   :  { %5180 = vmatpush3.msk.msra.mxu0 %vm540_vm11, %v2938_v28  ;;  %v6435_v28 = vld [vmem:[%s6837_s0 + $0x28] sm:$0xff] }
 0x76a   :  { %5182 = vmatmul.mubr.msk.f32.vlgmr.msra.gmra.mxu0 %vm490_vm12, %v2940_v10  ;;  %4712 = vmatprep.subr.msk.mxu0 %vm646_vm9, %v3062_v32  ;;  %v6440_v10 = vld [vmem:[%s6837_s0 + $0x38] sm:$0xff]  ;;  %v6447_v32 = vld [vmem:[%s6837_s0 + $0x20] sm:$0xff] }
 0x76b   :  { %4713 = vmatpush1.msk.msra.mxu0 %vm646_vm9, %v3061_v36  ;;  %3270 = vmatprep.mubr.f32.mxu0 %v5268_v30  ;;  %v6456_v36 = vld [vmem:[%s6837_s0 + $0x30] sm:$0xff] }
 0x76c   :  { %3234 = vmatprep.subr.mxu0 %v3046_v37  ;;  %v6465_v37 = vld [vmem:[%s6837_s0 + $0xc8] sm:$0xff] }
 0x76d   :  { %3235 = vmatpush1.msra.mxu0 %v3045_v42  ;;  %6854 = vst [vmem:[#allocation2_spill] sm:$0xff] %v6465_v37  ;;  %v6481_v42 = vld [vmem:[%s6837_s0 + $0xc0] sm:$0xff] }
 0x76e   :  { %3236 = vmatprep.subr.mxu0 %v3030_v52  ;;  %6856 = vst [vmem:[#allocation4_spill] sm:$0xff] %v6481_v42  ;;  %v6495_v52 = vld [vmem:[%s6837_s0 + $0x48] sm:$0xff] }
 0x76f   :  { %3237 = vmatpush1.msra.mxu0 %v3029_v54  ;;  %6858 = vst [vmem:[#allocation6_spill] sm:$0xff] %v6495_v52  ;;  %v6507_v54 = vld [vmem:[%s6837_s0 + $0x40] sm:$0xff] }
 0x770   :  { %4720 = vmatprep.subr.msk.mxu0 %vm646_vm9, %v3066_v56  ;;  %v6525_v56 = vld [vmem:[%s6837_s0 + $0xe8] sm:$0xff] }
 0x771   :  { %6860 = vst [vmem:[#allocation8_spill] sm:$0xff] %v6525_v56 }
 0x82a   :  { %v6182_v57 = vpop.f32.mrf.mxu0 }
 0x82c   :  { %v6184_v58 = vpop.f32.mrf.mxu0 }
 0x82d   :  { %4710 = vmatmul.mubr.msk.f32.vlgmr.msra.gmra.mxu1 %vm643_vm13, %v6184_v58  ;;  %4714 = vmatmul.mubr.msk.f32.vlgmr.msra.gmra.mxu0 %vm643_vm13, %v6184_v58 }
 0x82e   :  { %3199 = vmatprep.mubr.f32.mxu1 %v5268_v30  ;;  %3276 = vmatprep.mubr.f32.mxu0 %v5268_v30 }
 0x82f   :  { %4717 = vmatpush1.msk.msra.mxu1 %vm646_vm9, %v3063_v59  ;;  %4721 = vmatpush1.msk.msra.mxu0 %vm646_vm9, %v3065_v11  ;;  %v6546_v59 = vld [vmem:[%s6837_s0 + $0xf0] sm:$0xff]  ;;  %v6555_v11 = vld [vmem:[%s6837_s0 + $0x68] sm:$0xff] }
 0x830   :  { %3311 = vmatprep.subr.mxu1 %v3048_v12  ;;  %3388 = vmatprep.subr.mxu0 %v3050_v13  ;;  %6863 = vst [vmem:[#allocation11_spill] sm:$0xff] %v6546_v59  ;;  %6864 = vst [vmem:[#allocation12_spill] sm:$0xff] %v6555_v11  ;;  %v6560_v12 = vld [vmem:[%s6837_s0 + $0x78] sm:$0xff]  ;;  %v6567_v13 = vld [vmem:[%s6837_s0 + $0x60] sm:$0xff] }
 0x831   :  { %4711 = vmatmul.mubr.msk.f32.gmra.mxu1 %vm643_vm13, %v6182_v57  ;;  %4715 = vmatmul.mubr.msk.f32.gmra.mxu0 %vm643_vm13, %v6182_v57  ;;  %6865 = vst [vmem:[#allocation13_spill] sm:$0xff] %v6560_v12  ;;  %6866 = vst [vmem:[#allocation14_spill] sm:$0xff] %v6567_v13 }
 0x832   :  { %3312 = vmatpush1.msra.mxu1 %v3047_v60  ;;  %3389 = vmatpush1.msra.mxu0 %v3049_v61  ;;  %v6576_v60 = vld [vmem:[%s6837_s0 + $0x70] sm:$0xff] }
 0x833   :  { %3313 = vmatprep.subr.mxu1 %v3032_v62  ;;  %3390 = vmatprep.subr.mxu0 %v3034_v63  ;;  %6867 = vst [vmem:[#allocation15_spill] sm:$0xff] %v6576_v60 }
 0x834   :  { %3314 = vmatpush1.msra.mxu1 %v3031_v0  ;;  %3347 = vmatprep.mubr.f32.mxu1 %v5268_v30 }
 0x835   :  { %3391 = vmatpush1.msra.mxu0 %v3033_v16  ;;  %3424 = vmatprep.mubr.f32.mxu0 %v5268_v30 }
 0x836   :  { %4718 = vmatmul.mubr.msk.f32.vlgmr.msra.gmra.mxu1 %vm643_vm13, %v6184_v58  ;;  %4722 = vmatmul.mubr.msk.f32.vlgmr.msra.gmra.mxu0 %vm643_vm13, %v6184_v58 }
 0x837   :  { %4724 = vmatprep.subr.msk.mxu1 %vm646_vm9, %v3068_v18  ;;  %4728 = vmatprep.subr.msk.mxu0 %vm646_vm9, %v3070_v20 }
 0x838   :  { %3353 = vmatprep.mubr.f32.mxu1 %v5268_v30  ;;  %3430 = vmatprep.mubr.f32.mxu0 %v5268_v30 }
 0x839   :  { %4725 = vmatpush1.msk.msra.mxu1 %vm646_vm9, %v3067_v22  ;;  %4729 = vmatpush1.msk.msra.mxu0 %vm646_vm9, %v3069_v24 }
 0x83a   :  { %4719 = vmatmul.mubr.msk.f32.gmra.mxu1 %vm643_vm13, %v6182_v57  ;;  %4723 = vmatmul.mubr.msk.f32.gmra.mxu0 %vm643_vm13, %v6182_v57 }
 0x83b   :  { %3465 = vmatprep.subr.mxu1 %v3052_v26  ;;  %3542 = vmatprep.subr.mxu0 %v3054_v27 }
 0x83c   :  { %3466 = vmatpush1.msra.mxu1 %v3051_v29  ;;  %3543 = vmatpush1.msra.mxu0 %v3053_v31 }
 0x83d   :  { %3467 = vmatprep.subr.mxu1 %v3036_v33  ;;  %3544 = vmatprep.subr.mxu0 %v3038_v38 }
 0x83e   :  { %3468 = vmatpush1.msra.mxu1 %v3035_v40  ;;  %3501 = vmatprep.mubr.f32.mxu1 %v5268_v30 }
 0x83f   :  { %3545 = vmatpush1.msra.mxu0 %v3037_v41  ;;  %3578 = vmatprep.mubr.f32.mxu0 %v5268_v30 }
 0x840   :  { %4726 = vmatmul.mubr.msk.f32.vlgmr.msra.gmra.mxu1 %vm643_vm13, %v6184_v58  ;;  %4730 = vmatmul.mubr.msk.f32.vlgmr.msra.gmra.mxu0 %vm643_vm13, %v6184_v58 }
 0x841   :  { %4732 = vmatprep.subr.msk.mxu1 %vm646_vm9, %v3072_v43  ;;  %4736 = vmatprep.subr.msk.mxu0 %vm646_vm9, %v3074_v44 }
 0x842   :  { %3507 = vmatprep.mubr.f32.mxu1 %v5268_v30  ;;  %3584 = vmatprep.mubr.f32.mxu0 %v5268_v30 }
 0x843   :  { %4733 = vmatpush1.msk.msra.mxu1 %vm646_vm9, %v3071_v45  ;;  %4737 = vmatpush1.msk.msra.mxu0 %vm646_vm9, %v3073_v46 }
 0x844   :  { %4727 = vmatmul.mubr.msk.f32.gmra.mxu1 %vm643_vm13, %v6182_v57  ;;  %4731 = vmatmul.mubr.msk.f32.gmra.mxu0 %vm643_vm13, %v6182_v57 }
 0x845   :  { %3619 = vmatprep.subr.mxu1 %v3056_v47  ;;  %3696 = vmatprep.subr.mxu0 %v3058_v49 }
 0x846   :  { %3620 = vmatpush1.msra.mxu1 %v3055_v50  ;;  %3697 = vmatpush1.msra.mxu0 %v3057_v51 }
 0x847   :  { %3621 = vmatprep.subr.mxu1 %v3040_v1  ;;  %3698 = vmatprep.subr.mxu0 %v3042_v2 }
 0x848   :  { %3622 = vmatpush1.msra.mxu1 %v3039_v3  ;;  %3655 = vmatprep.mubr.f32.mxu1 %v5268_v30 }
 0x849   :  { %3699 = vmatpush1.msra.mxu0 %v3041_v4  ;;  %3732 = vmatprep.mubr.f32.mxu0 %v5268_v30 }
 0x84a   :  { %4734 = vmatmul.mubr.msk.f32.vlgmr.msra.gmra.mxu1 %vm643_vm13, %v6184_v58  ;;  %4738 = vmatmul.mubr.msk.f32.vlgmr.msra.gmra.mxu0 %vm643_vm13, %v6184_v58  ;;  %v6541_v58 = vld [vmem:[%s6837_s0 + $0xe0] sm:$0xff] }
 0x84b   :  { %3779 = vmatprep.subr.mxu1 %v6336_v5  ;;  %3856 = vmatprep.subr.mxu0 %v6341_v6  ;;  %6862 = vst [vmem:[#allocation10_spill] sm:$0xff] %v6541_v58 }
 0x84c   :  { %3661 = vmatprep.mubr.f32.mxu1 %v5268_v30  ;;  %3738 = vmatprep.mubr.f32.mxu0 %v5268_v30 }
 0x84d   :  { %3780 = vmatpush1.msra.mxu1 %v6351_v7  ;;  %3857 = vmatpush1.msra.mxu0 %v6356_v8 }
 0x84e   :  { %4735 = vmatmul.mubr.msk.f32.gmra.mxu1 %vm643_vm13, %v6182_v57  ;;  %4739 = vmatmul.mubr.msk.f32.gmra.mxu0 %vm643_vm13, %v6182_v57  ;;  %v6530_v57 = vld [vmem:[%s6837_s0 + $0xf8] sm:$0xff] }
 0x84f   :  { %3781 = vmatprep.subr.mxu1 %v6365_v34  ;;  %3858 = vmatprep.subr.mxu0 %v6370_v9  ;;  %6861 = vst [vmem:[#allocation9_spill] sm:$0xff] %v6530_v57 }
 0x850   :  { %3782 = vmatpush1.msra.mxu1 %v6377_v14  ;;  %3815 = vmatprep.mubr.f32.mxu1 %v5268_v30 }
 0x851   :  { %3859 = vmatpush1.msra.mxu0 %v6386_v15  ;;  %3892 = vmatprep.mubr.f32.mxu0 %v5268_v30 }
 0x852   :  { %4740 = vmatmul.mubr.msk.f32.vlgmr.msra.gmra.mxu1 %vm163_vm0, %v6393_v17  ;;  %4742 = vmatmul.mubr.msk.f32.vlgmr.msra.gmra.mxu0 %vm163_vm0, %v6393_v17 }
 0x853   :  { %3933 = vmatprep.subr.mxu1 %v6400_v19  ;;  %4010 = vmatprep.subr.mxu0 %v6405_v21 }
 0x854   :  { %3821 = vmatprep.mubr.f32.mxu1 %v5268_v30  ;;  %3898 = vmatprep.mubr.f32.mxu0 %v5268_v30 }
 0x855   :  { %3934 = vmatpush1.msra.mxu1 %v6416_v35  ;;  %4011 = vmatpush1.msra.mxu0 %v6421_v23 }
 0x856   :  { %4741 = vmatmul.mubr.msk.f32.gmra.mxu1 %vm163_vm0, %v6428_v25  ;;  %4743 = vmatmul.mubr.msk.f32.gmra.mxu0 %vm163_vm0, %v6428_v25 }
 0x857   :  { %3935 = vmatprep.subr.mxu1 %v6435_v28  ;;  %4012 = vmatprep.subr.mxu0 %v6440_v10 }
 0x858   :  { %3936 = vmatpush1.msra.mxu1 %v6447_v32  ;;  %3969 = vmatprep.mubr.f32.mxu1 %v5268_v30 }
 0x859   :  { %4013 = vmatpush1.msra.mxu0 %v6456_v36  ;;  %4046 = vmatprep.mubr.f32.mxu0 %v5268_v30 }
 0x85a   :  { %4744 = vmatmul.mubr.msk.f32.vlgmr.msra.gmra.mxu1 %vm163_vm0, %v6393_v17  ;;  %4746 = vmatmul.mubr.msk.f32.vlgmr.msra.gmra.mxu0 %vm163_vm0, %v6393_v17 }
 0x85b   :  { %4087 = vmatprep.subr.mxu1 %v6465_v37  ;;  %4164 = vmatprep.subr.mxu0 %v6470_v39 }
 0x85c   :  { %3975 = vmatprep.mubr.f32.mxu1 %v5268_v30  ;;  %4052 = vmatprep.mubr.f32.mxu0 %v5268_v30 }
 0x85d   :  { %4088 = vmatpush1.msra.mxu1 %v6481_v42  ;;  %4165 = vmatpush1.msra.mxu0 %v6486_v48 }
 0x85e   :  { %4745 = vmatmul.mubr.msk.f32.gmra.mxu1 %vm163_vm0, %v6428_v25  ;;  %4747 = vmatmul.mubr.msk.f32.gmra.mxu0 %vm163_vm0, %v6428_v25 }
 0x85f   :  { %4089 = vmatprep.subr.mxu1 %v6495_v52  ;;  %4166 = vmatprep.subr.mxu0 %v6500_v53 }
 0x860   :  { %4090 = vmatpush1.msra.mxu1 %v6507_v54  ;;  %4123 = vmatprep.mubr.f32.mxu1 %v5268_v30 }
 0x861   :  { %4167 = vmatpush1.msra.mxu0 %v6516_v55  ;;  %4200 = vmatprep.mubr.f32.mxu0 %v5268_v30 }
 0x862   :  { %4748 = vmatmul.mubr.msk.f32.vlgmr.msra.gmra.mxu1 %vm163_vm0, %v6393_v17  ;;  %4750 = vmatmul.mubr.msk.f32.vlgmr.msra.gmra.mxu0 %vm163_vm0, %v6393_v17 }
 0x863   :  { %4241 = vmatprep.subr.mxu1 %v6525_v56  ;;  %4318 = vmatprep.subr.mxu0 %v6530_v57 }
 0x864   :  { %4129 = vmatprep.mubr.f32.mxu1 %v5268_v30  ;;  %4206 = vmatprep.mubr.f32.mxu0 %v5268_v30 }
 0x865   :  { %4242 = vmatpush1.msra.mxu1 %v6541_v58  ;;  %4319 = vmatpush1.msra.mxu0 %v6546_v59  ;;  %v6638_v59 = vpop.permute.xlu0 %4371 }
 0x866   :  { %4749 = vmatmul.mubr.msk.f32.gmra.mxu1 %vm163_vm0, %v6428_v25  ;;  %4751 = vmatmul.mubr.msk.f32.gmra.mxu0 %vm163_vm0, %v6428_v25 }
 0x867   :  { %4243 = vmatprep.subr.mxu1 %v6555_v11  ;;  %4320 = vmatprep.subr.mxu0 %v6560_v12 }
 0x868   :  { %4244 = vmatpush1.msra.mxu1 %v6567_v13  ;;  %4277 = vmatprep.mubr.f32.mxu1 %v5268_v30 }
 0x869   :  { %4321 = vmatpush1.msra.mxu0 %v6576_v60  ;;  %4354 = vmatprep.mubr.f32.mxu0 %v5268_v30 }
 0x86a   :  { %4752 = vmatmul.mubr.msk.f32.vlgmr.msra.gmra.mxu1 %vm163_vm0, %v6393_v17  ;;  %4754 = vmatmul.mubr.msk.f32.vlgmr.msra.gmra.mxu0 %vm163_vm0, %v6393_v17 }
 0x86b   :  { %4283 = vmatprep.mubr.f32.mxu1 %v5268_v30  ;;  %4360 = vmatprep.mubr.f32.mxu0 %v5268_v30 }
 0x86e   :  { %4753 = vmatmul.mubr.msk.f32.gmra.mxu1 %vm163_vm0, %v6428_v25  ;;  %4755 = vmatmul.mubr.msk.f32.gmra.mxu0 %vm163_vm0, %v6428_v25 }
 0x8ed   :  { %v3195_v61 = vpop.f32.mrf.mxu1  ;;  %v3272_v62 = vpop.f32.mrf.mxu0 }
 0x8ef   :  { %v3197_v63 = vpop.f32.mrf.mxu1  ;;  %v3274_v0 = vpop.f32.mrf.mxu0 }
 0x8f1   :  { %v3201_v16 = vpop.f32.mrf.mxu1  ;;  %v3278_v18 = vpop.f32.mrf.mxu0 }
 0x8f3   :  { %v3203_v20 = vpop.f32.mrf.mxu1  ;;  %v3280_v22 = vpop.f32.mrf.mxu0 }
 0x8f6   :  { %v3349_v24 = vpop.f32.mrf.mxu1  ;;  %v3426_v26 = vpop.f32.mrf.mxu0 }
 0x8f8   :  { %v6594_v27 = vpop.f32.mrf.mxu1  ;;  %v6596_v29 = vpop.f32.mrf.mxu0 }
 0x8fa   :  { %v6598_v30 = vpop.f32.mrf.mxu1  ;;  %v6600_v31 = vpop.f32.mrf.mxu0 }
 0x8fc   :  { %v6602_v33 = vpop.f32.mrf.mxu1  ;;  %v6604_v38 = vpop.f32.mrf.mxu0 }
 0x900   :  { %v6606_v40 = vpop.f32.mrf.mxu1  ;;  %v6608_v41 = vpop.f32.mrf.mxu0 }
 0x902   :  { %v6610_v43 = vpop.f32.mrf.mxu1  ;;  %v6612_v44 = vpop.f32.mrf.mxu0 }
 0x904   :  { %v6614_v45 = vpop.f32.mrf.mxu1  ;;  %v6616_v46 = vpop.f32.mrf.mxu0 }
 0x906   :  { %v6618_v47 = vpop.f32.mrf.mxu1  ;;  %v6620_v49 = vpop.f32.mrf.mxu0 }
 0x90a   :  { %v6622_v50 = vpop.f32.mrf.mxu1  ;;  %v6624_v51 = vpop.f32.mrf.mxu0 }
 0x90c   :  { %v6626_v1 = vpop.f32.mrf.mxu1  ;;  %v6628_v2 = vpop.f32.mrf.mxu0 }
 0x90d   :  { %6868 = vst [vmem:[#allocation16_spill] sm:$0xff] %v6628_v2 }
 0x90e   :  { %v6630_v3 = vpop.f32.mrf.mxu1  ;;  %v6632_v4 = vpop.f32.mrf.mxu0 }
 0x90f   :  { %6869 = vst [vmem:[#allocation17_spill] sm:$0xff] %v6630_v3  ;;  %6870 = vst [vmem:[#allocation18_spill] sm:$0xff] %v6632_v4 }
 0x910   :  { %v6634_v17 = vpop.f32.mrf.mxu1  ;;  %v6636_v25 = vpop.f32.mrf.mxu0 }
 0x911   :  { %6871 = vst [vmem:[#allocation19_spill] sm:$0xff] %v6634_v17  ;;  %6872 = vst [vmem:[#allocation20_spill] sm:$0xff] %v6636_v25 }
 0x912   :  { %v3817_v57 = vpop.f32.mrf.mxu1  ;;  %v3894_v56 = vpop.f32.mrf.mxu0 }
 0x913   :  { %v3818_v58 = vadd.f32 %v3817_v57, %v3195_v61  ;;  %v3895_v12 = vadd.f32 %v3894_v56, %v3272_v62  ;;  %v6644_v61 = vpop.permute.xlu1 %4376 }
 0x914   :  { %v3819_v11 = vpop.f32.mrf.mxu1  ;;  %v3896_v60 = vpop.f32.mrf.mxu0 }
 0x915   :  { %v4379_v13 = vadd.f32 %v6638_v59, %v3818_v58  ;;  %v4381_v39 = vadd.f32 %v6638_v59, %v3895_v12  ;;  %v3820_v37 = vadd.f32 %v3819_v11, %v3197_v63  ;;  %v3897_v48 = vadd.f32 %v3896_v60, %v3274_v0 }
 0x916   :  { %v3823_v42 = vpop.f32.mrf.mxu1  ;;  %v3900_v4 = vpop.f32.mrf.mxu0 }
 0x917   :  { %v4411_v53 = vmul.f32 0.5, %v4379_v13  ;;  %v4413_v17 = vmul.f32 0.5, %v4381_v39  ;;  %v4380_v25 = vadd.f32 %v6638_v59, %v3820_v37  ;;  %v4382_v3 = vadd.f32 %v6638_v59, %v3897_v48 }
 0x918   :  { %v3824_v2 = vadd.f32 %v3823_v42, %v3201_v16  ;;  %v3901_v52 = vadd.f32 %v3900_v4, %v3278_v18  ;;  %v3825_v57 = vpop.f32.mrf.mxu1  ;;  %v3902_v56 = vpop.f32.mrf.mxu0 }
 0x919   :  { %5197 = vtanh.f32 %v4411_v53  ;;  %v4412_v58 = vmul.f32 0.5, %v4380_v25  ;;  %v4414_v62 = vmul.f32 0.5, %v4382_v3  ;;  %v3826_v12 = vadd.f32 %v3825_v57, %v3203_v20 }
 0x91a   :  { %5199 = vtanh.f32 %v4413_v17  ;;  %v4395_v11 = vadd.f32 %v6644_v61, %v3824_v2  ;;  %v4397_v13 = vadd.f32 %v6644_v61, %v3901_v52  ;;  %v3903_v39 = vadd.f32 %v3902_v56, %v3280_v22  ;;  %v3971_v60 = vpop.f32.mrf.mxu1  ;;  %v4048_v37 = vpop.f32.mrf.mxu0 }
 0x91b   :  { %5201 = vtanh.f32 %v4412_v58  ;;  %v4396_v42 = vadd.f32 %v6644_v61, %v3826_v12  ;;  %v3972_v48 = vadd.f32 %v3971_v60, %v3349_v24  ;;  %v4049_v63 = vadd.f32 %v4048_v37, %v3426_v26 }
 0x91c   :  { %5203 = vtanh.f32 %v4414_v62  ;;  %v4427_v0 = vmul.f32 0.5, %v4395_v11  ;;  %v4429_v16 = vmul.f32 0.5, %v4397_v13  ;;  %v4398_v53 = vadd.f32 %v6644_v61, %v3903_v39  ;;  %v3973_v18 = vpop.f32.mrf.mxu1  ;;  %v4050_v20 = vpop.f32.mrf.mxu0 }
 0x91d   :  { %v4428_v3 = vmul.f32 0.5, %v4396_v42  ;;  %v4383_v2 = vadd.f32 %v6638_v59, %v3972_v48  ;;  %v4385_v52 = vadd.f32 %v6638_v59, %v4049_v63  ;;  %v3974_v22 = vadd.f32 %v3973_v18, %v6594_v27 }
 0x91e   :  { %5205 = vtanh.f32 %v4427_v0  ;;  %v4430_v4 = vmul.f32 0.5, %v4398_v53  ;;  %v4051_v17 = vadd.f32 %v4050_v20, %v6596_v29  ;;  %v3977_v24 = vpop.f32.mrf.mxu1  ;;  %v4054_v26 = vpop.f32.mrf.mxu0 }
 0x91f   :  { %5207 = vtanh.f32 %v4429_v16  ;;  %v4415_v25 = vmul.f32 0.5, %v4383_v2  ;;  %v4417_v57 = vmul.f32 0.5, %v4385_v52  ;;  %v4384_v56 = vadd.f32 %v6638_v59, %v3974_v22 }
 0x920   :  { %5209 = vtanh.f32 %v4428_v3  ;;  %v4386_v58 = vadd.f32 %v6638_v59, %v4051_v17  ;;  %v3978_v62 = vadd.f32 %v3977_v24, %v6598_v30  ;;  %v4055_v12 = vadd.f32 %v4054_v26, %v6600_v31  ;;  %v3979_v11 = vpop.f32.mrf.mxu1  ;;  %v4056_v27 = vpop.f32.mrf.mxu0 }
 0x921   :  { %5211 = vtanh.f32 %v4430_v4  ;;  %v4416_v13 = vmul.f32 0.5, %v4384_v56  ;;  %v3980_v29 = vadd.f32 %v3979_v11, %v6602_v33  ;;  %v4057_v39 = vadd.f32 %v4056_v27, %v6604_v38 }
 0x922   :  { %5213 = vtanh.f32 %v4415_v25  ;;  %v4418_v60 = vmul.f32 0.5, %v4386_v58  ;;  %v4399_v37 = vadd.f32 %v6644_v61, %v3978_v62  ;;  %v4401_v42 = vadd.f32 %v6644_v61, %v4055_v12  ;;  %v4125_v48 = vpop.f32.mrf.mxu1  ;;  %v4202_v63 = vpop.f32.mrf.mxu0 }
 0x923   :  { %5215 = vtanh.f32 %v4417_v57  ;;  %v4400_v30 = vadd.f32 %v6644_v61, %v3980_v29  ;;  %v4402_v31 = vadd.f32 %v6644_v61, %v4057_v39  ;;  %v4126_v0 = vadd.f32 %v4125_v48, %v6606_v40 }
 0x924   :  { %5217 = vtanh.f32 %v4416_v13  ;;  %v4431_v16 = vmul.f32 0.5, %v4399_v37  ;;  %v4433_v33 = vmul.f32 0.5, %v4401_v42  ;;  %v4203_v38 = vadd.f32 %v4202_v63, %v6608_v41  ;;  %v4127_v53 = vpop.f32.mrf.mxu1  ;;  %v4204_v18 = vpop.f32.mrf.mxu0 }
 0x925   :  { %5219 = vtanh.f32 %v4418_v60  ;;  %v4432_v20 = vmul.f32 0.5, %v4400_v30  ;;  %v4434_v3 = vmul.f32 0.5, %v4402_v31  ;;  %v4387_v2 = vadd.f32 %v6638_v59, %v4126_v0 }
 0x926   :  { %v5198_v52 = vpop.eup %5197  ;;  %5221 = vtanh.f32 %v4431_v16  ;;  %v4389_v22 = vadd.f32 %v6638_v59, %v4203_v38  ;;  %v4128_v4 = vadd.f32 %v4127_v53, %v6610_v43  ;;  %v4205_v40 = vadd.f32 %v4204_v18, %v6612_v44  ;;  %v4131_v17 = vpop.f32.mrf.mxu1 }
 0x927   :  { %v5200_v24 = vpop.eup %5199  ;;  %v4475_v26 = vadd.f32 1.0, %v5198_v52  ;;  %5223 = vtanh.f32 %v4433_v33  ;;  %v4419_v41 = vmul.f32 0.5, %v4387_v2  ;;  %v4132_v25 = vadd.f32 %v4131_v17, %v6614_v45  ;;  %v4208_v39 = vpop.f32.mrf.mxu0 }
 0x928   :  { %v5202_v57 = vpop.eup %5201  ;;  %v4477_v56 = vadd.f32 1.0, %v5200_v24  ;;  %5225 = vtanh.f32 %v4432_v20  ;;  %v4421_v58 = vmul.f32 0.5, %v4389_v22  ;;  %v4388_v62 = vadd.f32 %v6638_v59, %v4128_v4  ;;  %v4133_v0 = vpop.f32.mrf.mxu1 }
 0x929   :  { %v5204_v12 = vpop.eup %5203  ;;  %v4507_v11 = vmul.f32 0.5, %v4475_v26  ;;  %v4476_v27 = vadd.f32 1.0, %v5202_v57  ;;  %5227 = vtanh.f32 %v4434_v3  ;;  %v4390_v43 = vadd.f32 %v6638_v59, %v4205_v40  ;;  %v4210_v2 = vpop.f32.mrf.mxu0 }
 0x92a   :  { %v4509_v44 = vmul.f32 0.5, %v4477_v56  ;;  %v4478_v13 = vadd.f32 1.0, %v5204_v12  ;;  %5229 = vtanh.f32 %v4419_v41  ;;  %v4420_v29 = vmul.f32 0.5, %v4388_v62 }
 0x92b   :  { %v5206_v60 = vpop.eup %5205  ;;  %v4539_v45 = vmul.f32 %v4507_v11, %v6377_v14  ;;  %v4508_v37 = vmul.f32 0.5, %v4476_v27  ;;  %5231 = vtanh.f32 %v4421_v58  ;;  %v4422_v42 = vmul.f32 0.5, %v4390_v43  ;;  %v4279_v11 = vpop.f32.mrf.mxu1 }
 0x92c   :  { %v5208_v48 = vpop.eup %5207  ;;  %v4541_v63 = vmul.f32 %v4509_v44, %v6386_v15  ;;  %v4510_v30 = vmul.f32 0.5, %v4478_v13  ;;  %v4491_v31 = vadd.f32 1.0, %v5206_v60  ;;  %5233 = vtanh.f32 %v4420_v29  ;;  %v4356_v27 = vpop.f32.mrf.mxu0 }
 0x92d   :  { %v5210_v16 = vpop.eup %5209  ;;  %4571 = vst [vmem:[%s6839_s15] sm:$0xff] %v4539_v45  ;;  %v4540_v33 = vmul.f32 %v4508_v37, %v6365_v34  ;;  %v4493_v38 = vadd.f32 1.0, %v5208_v48  ;;  %5235 = vtanh.f32 %v4422_v42  ;;  %v4403_v14 = vadd.f32 %v6644_v61, %v4132_v25 }
 0x92e   :  { %v5212_v53 = vpop.eup %5211  ;;  %4573 = vst [vmem:[%s6839_s15 + $0x10] sm:$0xff] %v4541_v63  ;;  %v4542_v15 = vmul.f32 %v4510_v30, %v6370_v9  ;;  %v4523_v18 = vmul.f32 0.5, %v4491_v31  ;;  %v4492_v20 = vadd.f32 1.0, %v5210_v16  ;;  %v4209_v3 = vadd.f32 %v4208_v39, %v6616_v46 }
 0x92f   :  { %v5214_v52 = vpop.eup %5213  ;;  %4572 = vst [vmem:[%s6839_s15 + $0x8] sm:$0xff] %v4540_v33  ;;  %v4525_v34 = vmul.f32 0.5, %v4493_v38  ;;  %v4494_v22 = vadd.f32 1.0, %v5212_v53  ;;  %v4435_v4 = vmul.f32 0.5, %v4403_v14  ;;  %v4134_v40 = vadd.f32 %v4133_v0, %v6618_v47  ;;  %v4281_v33 = vpop.f32.mrf.mxu1 }
 0x930   :  { %v5216_v17 = vpop.eup %5215  ;;  %4574 = vst [vmem:[%s6839_s15 + $0x18] sm:$0xff] %v4542_v15  ;;  %v4555_v9 = vmul.f32 %v4523_v18, %v6351_v7  ;;  %v4524_v24 = vmul.f32 0.5, %v4492_v20  ;;  %v4479_v46 = vadd.f32 1.0, %v5214_v52  ;;  %v4405_v26 = vadd.f32 %v6644_v61, %v4209_v3  ;;  %v4358_v38 = vpop.f32.mrf.mxu0 }
 0x931   :  { %v5218_v41 = vpop.eup %5217  ;;  %v4557_v25 = vmul.f32 %v4525_v34, %v6356_v8  ;;  %v4526_v57 = vmul.f32 0.5, %v4494_v22  ;;  %v4481_v56 = vadd.f32 1.0, %v5216_v17  ;;  %5237 = vtanh.f32 %v4435_v4 }
 0x932   :  { %v5220_v58 = vpop.eup %5219  ;;  %4587 = vst [vmem:[%s6839_s15 + $0x80] sm:$0xff] %v4555_v9  ;;  %v4556_v47 = vmul.f32 %v4524_v24, %v6336_v5  ;;  %v4511_v62 = vmul.f32 0.5, %v4479_v46  ;;  %v4480_v12 = vadd.f32 1.0, %v5218_v41  ;;  %v4437_v7 = vmul.f32 0.5, %v4405_v26  ;;  %v4285_v24 = vpop.f32.mrf.mxu1 }
 0x933   :  { %v5222_v43 = vpop.eup %5221  ;;  %4589 = vst [vmem:[%s6839_s15 + $0x90] sm:$0xff] %v4557_v25  ;;  %v4558_v8 = vmul.f32 %v4526_v57, %v6341_v6  ;;  %v4513_v44 = vmul.f32 0.5, %v4481_v56  ;;  %v4482_v13 = vadd.f32 1.0, %v5220_v58  ;;  %v4404_v29 = vadd.f32 %v6644_v61, %v4134_v40  ;;  %v4362_v46 = vpop.f32.mrf.mxu0 }
 0x934   :  { %v5224_v39 = vpop.eup %5223  ;;  %4588 = vst [vmem:[%s6839_s15 + $0x88] sm:$0xff] %v4556_v47  ;;  %v4543_v5 = vmul.f32 %v4511_v62, %v6447_v32  ;;  %v4512_v60 = vmul.f32 0.5, %v4480_v12  ;;  %v4495_v45 = vadd.f32 1.0, %v5222_v43  ;;  %5239 = vtanh.f32 %v4437_v7 }
 0x935   :  { %v5226_v37 = vpop.eup %5225  ;;  %4590 = vst [vmem:[%s6839_s15 + $0x98] sm:$0xff] %v4558_v8  ;;  %v4545_v6 = vmul.f32 %v4513_v44, %v6456_v36  ;;  %v4514_v42 = vmul.f32 0.5, %v4482_v13  ;;  %v4497_v48 = vadd.f32 1.0, %v5224_v39  ;;  %v4436_v63 = vmul.f32 0.5, %v4404_v29  ;;  %v4287_v8 = vpop.f32.mrf.mxu1 }
 0x936   :  { %v5228_v30 = vpop.eup %5227  ;;  %4575 = vst [vmem:[%s6839_s15 + $0x20] sm:$0xff] %v4543_v5  ;;  %v4544_v32 = vmul.f32 %v4512_v60, %v6435_v28  ;;  %v4527_v31 = vmul.f32 0.5, %v4495_v45  ;;  %v4496_v0 = vadd.f32 1.0, %v5226_v37  ;;  %v4211_v16 = vadd.f32 %v4210_v2, %v6620_v49  ;;  %v4364_v44 = vpop.f32.mrf.mxu0  ;;  %v6877_v45 = vld [vmem:[#allocation18_spill] sm:$0xff] }
 0x937   :  { %v5230_v14 = vpop.eup %5229  ;;  %4577 = vst [vmem:[%s6839_s15 + $0x30] sm:$0xff] %v4545_v6  ;;  %v4546_v36 = vmul.f32 %v4514_v42, %v6440_v10  ;;  %v4529_v53 = vmul.f32 0.5, %v4497_v48  ;;  %v4498_v15 = vadd.f32 1.0, %v5228_v30  ;;  %5241 = vtanh.f32 %v4436_v63  ;;  %v6878_v63 = vld [vmem:[#allocation19_spill] sm:$0xff] }
 0x938   :  { %v5232_v18 = vpop.eup %5231  ;;  %4576 = vst [vmem:[%s6839_s15 + $0x28] sm:$0xff] %v4544_v32  ;;  %v4559_v28 = vmul.f32 %v4527_v31, %v6416_v35  ;;  %v4528_v49 = vmul.f32 0.5, %v4496_v0  ;;  %v4483_v20 = vadd.f32 1.0, %v5230_v14  ;;  %v4406_v3 = vadd.f32 %v6644_v61, %v4211_v16  ;;  %v6879_v32 = vld [vmem:[#allocation20_spill] sm:$0xff] }
 0x939   :  { %v5234_v2 = vpop.eup %5233  ;;  %4578 = vst [vmem:[%s6839_s15 + $0x38] sm:$0xff] %v4546_v36  ;;  %v4561_v10 = vmul.f32 %v4529_v53, %v6421_v23  ;;  %v4530_v52 = vmul.f32 0.5, %v4498_v15  ;;  %v4485_v34 = vadd.f32 1.0, %v5232_v18  ;;  %v4280_v22 = vadd.f32 %v4279_v11, %v6622_v50 }
 0x93a   :  { %v5236_v4 = vpop.eup %5235  ;;  %4591 = vst [vmem:[%s6839_s15 + $0xa0] sm:$0xff] %v4559_v28  ;;  %v4560_v35 = vmul.f32 %v4528_v49, %v6400_v19  ;;  %v4515_v40 = vmul.f32 0.5, %v4483_v20  ;;  %v4484_v17 = vadd.f32 1.0, %v5234_v2  ;;  %v4438_v9 = vmul.f32 0.5, %v4406_v3  ;;  %v6881_v3 = vld [vmem:[#allocation5_spill] sm:$0xff] }
 0x93b   :  { %4593 = vst [vmem:[%s6839_s15 + $0xb0] sm:$0xff] %v4561_v10  ;;  %v4562_v23 = vmul.f32 %v4530_v52, %v6405_v21  ;;  %v4517_v26 = vmul.f32 0.5, %v4485_v34  ;;  %v4486_v50 = vadd.f32 1.0, %v5236_v4  ;;  %v4391_v41 = vadd.f32 %v6638_v59, %v4280_v22 }
 0x93c   :  { %4592 = vst [vmem:[%s6839_s15 + $0xa8] sm:$0xff] %v4560_v35  ;;  %v4547_v19 = vmul.f32 %v4515_v40, %v6507_v54  ;;  %v4516_v25 = vmul.f32 0.5, %v4484_v17  ;;  %5243 = vtanh.f32 %v4438_v9  ;;  %v4357_v57 = vadd.f32 %v4356_v27, %v6624_v51  ;;  %v6873_v54 = vld [vmem:[#allocation6_spill] sm:$0xff]  ;;  %v6874_v51 = vld [vmem:[#allocation16_spill] sm:$0xff]  ;;  %v6875_v27 = vld [vmem:[#allocation17_spill] sm:$0xff] }
 0x93d   :  { %4594 = vst [vmem:[%s6839_s15 + $0xb8] sm:$0xff] %v4562_v23  ;;  %v4549_v21 = vmul.f32 %v4517_v26, %v6516_v55  ;;  %v4518_v56 = vmul.f32 0.5, %v4486_v50  ;;  %v4423_v58 = vmul.f32 0.5, %v4391_v41  ;;  %v4282_v47 = vadd.f32 %v4281_v33, %v6626_v1  ;;  %v6876_v55 = vld [vmem:[#allocation7_spill] sm:$0xff] }
 0x93e   :  { %v5238_v62 = vpop.eup %5237  ;;  %4579 = vst [vmem:[%s6839_s15 + $0x40] sm:$0xff] %v4547_v19  ;;  %v4548_v12 = vmul.f32 %v4516_v25, %v6873_v54  ;;  %v4393_v7 = vadd.f32 %v6638_v59, %v4357_v57  ;;  %v4359_v11 = vadd.f32 %v4358_v38, %v6874_v51  ;;  %v4286_v43 = vadd.f32 %v4285_v24, %v6875_v27  ;;  %v6883_v9 = vld [vmem:[#allocation3_spill] sm:$0xff]  ;;  %v6884_v19 = vld [vmem:[#allocation14_spill] sm:$0xff]  ;;  %v6886_v27 = vld [vmem:[#allocation12_spill] sm:$0xff] }
 0x93f   :  { %4581 = vst [vmem:[%s6839_s15 + $0x50] sm:$0xff] %v4549_v21  ;;  %v4550_v1 = vmul.f32 %v4518_v56, %v6876_v55  ;;  %v4499_v13 = vadd.f32 1.0, %v5238_v62  ;;  %5245 = vtanh.f32 %v4423_v58  ;;  %v4392_v29 = vadd.f32 %v6638_v59, %v4282_v47 }
 0x940   :  { %4580 = vst [vmem:[%s6839_s15 + $0x48] sm:$0xff] %v4548_v12  ;;  %v4425_v39 = vmul.f32 0.5, %v4393_v7  ;;  %v4394_v5 = vadd.f32 %v6638_v59, %v4359_v11  ;;  %v4407_v60 = vadd.f32 %v6644_v61, %v4286_v43  ;;  %v4363_v37 = vadd.f32 %v4362_v46, %v6877_v45  ;;  %v6880_v59 = vld [vmem:[#allocation4_spill] sm:$0xff]  ;;  %v6885_v12 = vld [vmem:[#allocation15_spill] sm:$0xff] }
 0x941   :  { %v5240_v6 = vpop.eup %5239  ;;  %4582 = vst [vmem:[%s6839_s15 + $0x58] sm:$0xff] %v4550_v1  ;;  %v4531_v42 = vmul.f32 0.5, %v4499_v13  ;;  %v4424_v48 = vmul.f32 0.5, %v4392_v29  ;;  %v4288_v30 = vadd.f32 %v4287_v8, %v6878_v63  ;;  %v4365_v31 = vadd.f32 %v4364_v44, %v6879_v32  ;;  %v6887_v1 = vld [vmem:[#allocation13_spill] sm:$0xff]  ;;  %v6890_v63 = vld [vmem:[#allocation8_spill] sm:$0xff] }
 0x942   :  { %v4501_v0 = vadd.f32 1.0, %v5240_v6  ;;  %5247 = vtanh.f32 %v4425_v39  ;;  %v4426_v16 = vmul.f32 0.5, %v4394_v5  ;;  %v4439_v33 = vmul.f32 0.5, %v4407_v60  ;;  %v6888_v39 = vld [vmem:[#allocation10_spill] sm:$0xff]  ;;  %v6889_v6 = vld [vmem:[#allocation11_spill] sm:$0xff]  ;;  %v6891_v32 = vld [vmem:[#allocation9_spill] sm:$0xff] }
 0x943   :  { %v4563_v38 = vmul.f32 %v4531_v42, %v6880_v59  ;;  %5249 = vtanh.f32 %v4424_v48  ;;  %v4409_v14 = vadd.f32 %v6644_v61, %v4363_v37  ;;  %v4408_v36 = vadd.f32 %v6644_v61, %v4288_v30 }
 0x944   :  { %v5242_v53 = vpop.eup %5241  ;;  %v4533_v15 = vmul.f32 0.5, %v4501_v0  ;;  %5251 = vtanh.f32 %v4426_v16  ;;  %v4410_v18 = vadd.f32 %v6644_v61, %v4365_v31  ;;  %v6882_v61 = vld [vmem:[#allocation2_spill] sm:$0xff] }
 0x945   :  { %4595 = vst [vmem:[%s6839_s15 + $0xc0] sm:$0xff] %v4563_v38  ;;  %v4500_v28 = vadd.f32 1.0, %v5242_v53  ;;  %5253 = vtanh.f32 %v4439_v33  ;;  %v4441_v49 = vmul.f32 0.5, %v4409_v14  ;;  %v4440_v20 = vmul.f32 0.5, %v4408_v36 }
 0x946   :  { %v4565_v2 = vmul.f32 %v4533_v15, %v6881_v3  ;;  %v4442_v10 = vmul.f32 0.5, %v4410_v18 }
 0x947   :  { %v4532_v52 = vmul.f32 0.5, %v4500_v28  ;;  %5255 = vtanh.f32 %v4441_v49 }
 0x948   :  { %4597 = vst [vmem:[%s6839_s15 + $0xd0] sm:$0xff] %v4565_v2  ;;  %5257 = vtanh.f32 %v4440_v20 }
 0x949   :  { %v5244_v34 = vpop.eup %5243  ;;  %v4564_v22 = vmul.f32 %v4532_v52, %v6882_v61  ;;  %5259 = vtanh.f32 %v4442_v10 }
 0x94a   :  { %v4502_v4 = vadd.f32 1.0, %v5244_v34 }
 0x94b   :  { %4596 = vst [vmem:[%s6839_s15 + $0xc8] sm:$0xff] %v4564_v22 }
 0x94c   :  { %v5246_v35 = vpop.eup %5245  ;;  %v4534_v40 = vmul.f32 0.5, %v4502_v4 }
 0x94d   :  { %v4487_v17 = vadd.f32 1.0, %v5246_v35 }
 0x94e   :  { %v4566_v24 = vmul.f32 %v4534_v40, %v6883_v9 }
 0x94f   :  { %v5248_v46 = vpop.eup %5247  ;;  %v4519_v23 = vmul.f32 0.5, %v4487_v17 }
 0x950   :  { %v5250_v26 = vpop.eup %5249  ;;  %4598 = vst [vmem:[%s6839_s15 + $0xd8] sm:$0xff] %v4566_v24  ;;  %v4489_v50 = vadd.f32 1.0, %v5248_v46 }
 0x951   :  { %v5252_v41 = vpop.eup %5251  ;;  %v4551_v25 = vmul.f32 %v4519_v23, %v6884_v19  ;;  %v4488_v57 = vadd.f32 1.0, %v5250_v26 }
 0x952   :  { %v5254_v21 = vpop.eup %5253  ;;  %v4521_v56 = vmul.f32 0.5, %v4489_v50  ;;  %v4490_v58 = vadd.f32 1.0, %v5252_v41 }
 0x953   :  { %4583 = vst [vmem:[%s6839_s15 + $0x60] sm:$0xff] %v4551_v25  ;;  %v4520_v47 = vmul.f32 0.5, %v4488_v57  ;;  %v4503_v62 = vadd.f32 1.0, %v5254_v21 }
 0x954   :  { %v5256_v54 = vpop.eup %5255  ;;  %v4553_v7 = vmul.f32 %v4521_v56, %v6885_v12  ;;  %v4522_v51 = vmul.f32 0.5, %v4490_v58 }
 0x955   :  { %v5258_v11 = vpop.eup %5257  ;;  %v4552_v43 = vmul.f32 %v4520_v47, %v6886_v27  ;;  %v4535_v8 = vmul.f32 0.5, %v4503_v62  ;;  %v4505_v44 = vadd.f32 1.0, %v5256_v54 }
 0x956   :  { %v5260_v55 = vpop.eup %5259  ;;  %4585 = vst [vmem:[%s6839_s15 + $0x70] sm:$0xff] %v4553_v7  ;;  %v4554_v13 = vmul.f32 %v4522_v51, %v6887_v1  ;;  %v4504_v29 = vadd.f32 1.0, %v5258_v11 }
 0x957   :  { %4584 = vst [vmem:[%s6839_s15 + $0x68] sm:$0xff] %v4552_v43  ;;  %v4567_v5 = vmul.f32 %v4535_v8, %v6888_v39  ;;  %v4537_v60 = vmul.f32 0.5, %v4505_v44  ;;  %v4506_v45 = vadd.f32 1.0, %v5260_v55 }
 0x958   :  { %4586 = vst [vmem:[%s6839_s15 + $0x78] sm:$0xff] %v4554_v13  ;;  %v4536_v37 = vmul.f32 0.5, %v4504_v29 }
 0x959   :  { %4599 = vst [vmem:[%s6839_s15 + $0xe0] sm:$0xff] %v4567_v5  ;;  %v4569_v42 = vmul.f32 %v4537_v60, %v6889_v6  ;;  %v4538_v48 = vmul.f32 0.5, %v4506_v45 }
 0x95a   :  { %v4568_v30 = vmul.f32 %v4536_v37, %v6890_v63 }
 0x95b   :  { %4601 = vst [vmem:[%s6839_s15 + $0xf0] sm:$0xff] %v4569_v42  ;;  %v4570_v31 = vmul.f32 %v4538_v48, %v6891_v32 }
 0x95c   :  { %4600 = vst [vmem:[%s6839_s15 + $0xe8] sm:$0xff] %v4568_v30 }
 0x95d   :  { %4602 = vst [vmem:[%s6839_s15 + $0xf8] sm:$0xff] %v4570_v31 }

</bundles_post_ra>
